<compile_context>
chip_gen: v6e
topology: v6e:2x2x1
jax: 0.10.0
libtpu: 0.0.40
codegen_flags: <defaults>
</compile_context>

<pallas_src>
import numpy as np
import jax
import jax.numpy as jnp
from jax.experimental import pallas as pl
from jax.experimental.pallas import tpu as pltpu

XIN = 128          # 108 board features + turn + constant-1 carrier + pad
HID = 640          # 64*9 = 576 conv features + turn carry + bias carry + pad
NOUT = 128         # 81 moves padded to one lane tile
N_MOVES = 81
N_BOARD = 108      # 12 channels * 3 * 3
TURN_COL = 108     # input column holding `turn`
ONE_COL = 109      # input column holding the constant 1.0 (bias carrier)
TURN_CARRY = 576   # hidden column carrying `turn` through the conv stack
ONE_CARRY = 577    # hidden column carrying the constant 1.0 (bias carrier)
_NEG_INF = -1e30


# --------------------------------------------------------------------------
# Pallas kernel: whole forward pass, all operands VMEM-resident.
# Every layer is dot -> ReLU (biases + BN are folded into the matrices).
# --------------------------------------------------------------------------
def policy_kernel(x_ref, m1_ref, m2_ref, m3_ref, wa_ref, w2_ref, bh2_ref,
                  out_ref):
    f32, bf16 = jnp.float32, jnp.bfloat16

    # conv1 + bias + BN1 + ReLU    (bias rides in the constant-1 carrier row)
    h = jnp.maximum(
        jnp.dot(x_ref[...], m1_ref[...], preferred_element_type=f32), 0.0)
    # conv2 + bias + BN2 + ReLU
    h = jnp.maximum(
        jnp.dot(h.astype(bf16), m2_ref[...], preferred_element_type=f32), 0.0)
    # conv3 + bias + BN3 + ReLU
    h = jnp.maximum(
        jnp.dot(h.astype(bf16), m3_ref[...], preferred_element_type=f32), 0.0)
    # head Linear(577, 128) + ReLU  (`turn` + bias ride in carrier columns)
    z = jnp.maximum(
        jnp.dot(h.astype(bf16), wa_ref[...], preferred_element_type=f32), 0.0)
    # Dropout(p=0.2): identity in eval mode.

    # head Linear(128, 81) -> softmax (padded lanes have bias -1e30 -> exp=0)
    logits = jnp.dot(z.astype(bf16), w2_ref[...],
                     preferred_element_type=f32) + bh2_ref[...]
    m = jnp.max(logits, axis=-1, keepdims=True)
    e = jnp.exp(logits - m)
    inv = pl.reciprocal(jnp.sum(e, axis=-1, keepdims=True), approx=True)
    out_ref[...] = e * inv


# --------------------------------------------------------------------------
# One-time host-side weight preprocessing (hoisted out of the call path).
# --------------------------------------------------------------------------
def _conv3x3_to_matmul(w):
    """(Co, Ci, 3, 3) conv weight (pad=1, stride=1) on the fixed 3x3 grid ->
    (Ci*9, Co*9) matrix M with y_flat = x_flat @ M; both sides flattened
    channel-major / spatial(h*3+w)-minor (matches PyTorch NCHW .view)."""
    w = np.asarray(w, dtype=np.float32)
    ci, co = w.shape[1], w.shape[0]
    g = np.zeros((9, 9, 3, 3), dtype=np.float32)
    for p in range(9):
        oh, ow = p // 3, p % 3
        for kh in range(3):
            for kw in range(3):
                ih, iw = oh + kh - 1, ow + kw - 1
                if 0 <= ih < 3 and 0 <= iw < 3:
                    g[ih * 3 + iw, p, kh, kw] = 1.0
    return np.einsum('ockl,spkl->csop', w, g).reshape(ci * 9, co * 9)


def _fold_conv_bn(w, b, gamma, beta, mean, var, eps=1e-5):
    """Fold conv bias + eval-mode BatchNorm into matmul matrix + bias row."""
    m = _conv3x3_to_matmul(w)                               # (Ci*9, Co*9)
    gamma, beta = np.asarray(gamma, np.float32), np.asarray(beta, np.float32)
    mean, var = np.asarray(mean, np.float32), np.asarray(var, np.float32)
    b = np.asarray(b, np.float32)
    scale = gamma / np.sqrt(var + eps)                      # (Co,)
    bias = (b - mean) * scale + beta                        # (Co,)
    m = m * np.repeat(scale, 9)[None, :]                    # fold BN scale
    return m, np.repeat(bias, 9)


def _board_row_permutation():
    """Permutation folding PyTorch's permute(0,1,4,2,3) into M1's rows:
    raw flatten index r (of board (2,3,3,6)) -> channel-major index q."""
    perm = np.empty(N_BOARD, dtype=np.int64)
    for a in range(2):
        for h in range(3):
            for w in range(3):
                for f in range(6):
                    r = a * 54 + h * 18 + w * 6 + f
                    perm[r] = (a * 6 + f) * 9 + h * 3 + w
    return perm


def prepare_weights(params):
    """Build padded, BN-folded, bias-folded, bf16 kernel weights (call ONCE)."""
    p = {k: np.asarray(v, np.float32) for k, v in params.items()}

    m1, c1 = _fold_conv_bn(p['w_c1'], p['b_c1'], p['bn1_gamma'], p['bn1_beta'],
                           p['bn1_mean'], p['bn1_var'])
    m2, c2 = _fold_conv_bn(p['w_c2'], p['b_c2'], p['bn2_gamma'], p['bn2_beta'],
                           p['bn2_mean'], p['bn2_var'])
    m3, c3 = _fold_conv_bn(p['w_c3'], p['b_c3'], p['bn3_gamma'], p['bn3_beta'],
                           p['bn3_mean'], p['bn3_var'])

    # Fold the input permutation into the rows of M1 so the wrapper can feed
    # board_tensor.reshape(B, 108) directly (no transpose in the call path).
    m1 = m1[_board_row_permutation(), :]

    # NOTE: HID stays 640 (= 5 x 128) — minimal lane-aligned width on all gens.
    M1 = np.zeros((XIN, HID), np.float32)
    M1[:N_BOARD, :576] = m1
    M1[TURN_COL, TURN_CARRY] = 1.0       # carry `turn` into the hidden state
    M1[ONE_COL, :576] = c1               # conv1+BN1 bias via constant-1 row
    M1[ONE_COL, ONE_CARRY] = 1.0         # keep the constant-1 carrier alive

    M2 = np.zeros((HID, HID), np.float32)
    M2[:576, :576] = m2
    M2[TURN_CARRY, TURN_CARRY] = 1.0     # ReLU(0/1) = 0/1 -> carry survives
    M2[ONE_CARRY, :576] = c2
    M2[ONE_CARRY, ONE_CARRY] = 1.0

    M3 = np.zeros((HID, HID), np.float32)
    M3[:576, :576] = m3
    M3[TURN_CARRY, TURN_CARRY] = 1.0
    M3[ONE_CARRY, :576] = c3
    M3[ONE_CARRY, ONE_CARRY] = 1.0

    WA = np.zeros((HID, 128), np.float32)
    WA[:576, :] = p['w_h1'][:, :576].T   # conv-feature columns of Linear(577,128)
    WA[TURN_CARRY, :] = p['w_h1'][:, 576]  # the `turn` input column
    WA[ONE_CARRY, :] = p['b_h1']         # head bias via the constant-1 carrier

    W2 = np.zeros((128, NOUT), np.float32)
    W2[:, :N_MOVES] = p['w_h2'].T
    BH2 = np.full((1, NOUT), _NEG_INF, np.float32)   # padded lanes -> exp = 0
    BH2[0, :N_MOVES] = p['b_h2']

    bf16 = jnp.bfloat16
    return dict(
        m1=jnp.asarray(M1, bf16), m2=jnp.asarray(M2, bf16),
        m3=jnp.asarray(M3, bf16), wa=jnp.asarray(WA, bf16),
        w2=jnp.asarray(W2, bf16), bh2=jnp.asarray(BH2, jnp.float32),
    )


# --------------------------------------------------------------------------
# Forward wrapper (jit'd; only a reshape/concat/pad + the pallas_call).
# --------------------------------------------------------------------------
def _round_up(x, m):
    return (x + m - 1) // m * m


def _cdiv(a, b):
    return -(-a // b)


def _choose_batch_tile(bsz):
    """>= 2 grid steps once bsz > 16 (so v7x's 2nd TensorCore gets work),
    <= 512 rows per tile, tile a multiple of 16 (bf16 sublane packing),
    and minimal batch padding waste."""
    n_steps = max(1, _cdiv(bsz, 512))
    if bsz > 16:
        n_steps = max(n_steps, 2)
    tb = _round_up(_cdiv(bsz, n_steps), 16)
    b_pad = _round_up(bsz, tb)
    return tb, b_pad


@jax.jit
def policy_net_forward(weights, board_tensor, turn):
    """board_tensor: (B, 2, 3, 3, 6), turn: (B,) in {0, 1}
    -> (B, 81) probability distribution over moves."""
    bsz = board_tensor.shape[0]
    tb, b_pad = _choose_batch_tile(bsz)

    # Fused input assembly: raw flatten (permutation is folded into M1's rows),
    # append turn + constant-1 bias carrier, zero-pad to (b_pad, 128) bf16.
    x = jnp.concatenate(
        [board_tensor.reshape(bsz, N_BOARD).astype(jnp.bfloat16),
         turn.reshape(bsz, 1).astype(jnp.bfloat16),
         jnp.ones((bsz, 1), jnp.bfloat16)], axis=1)          # (bsz, 110)
    x = jnp.pad(x, ((0, b_pad - bsz), (0, XIN - (N_BOARD + 2))))

    grid = (b_pad // tb,)
    const = lambda i: (0, 0)              # weights resident across the grid
    w = weights

    wbytes = sum(int(np.prod(a.shape)) * a.dtype.itemsize for a in w.values())
    cost = pl.CostEstimate(
        flops=2 * b_pad * (XIN * HID + 2 * HID * HID + HID * 128 + 128 * NOUT),
        transcendentals=b_pad * NOUT,
        bytes_accessed=wbytes + b_pad * (XIN * 2 + NOUT * 4),
    )

    probs = pl.pallas_call(
        policy_kernel,
        out_shape=jax.ShapeDtypeStruct((b_pad, NOUT), jnp.float32),
        grid=grid,
        in_specs=[
            pl.BlockSpec((tb, XIN), lambda i: (i, 0)),     # x tile
            pl.BlockSpec((XIN, HID), const),               # m1 (conv1+BN1+bias)
            pl.BlockSpec((HID, HID), const),               # m2 (conv2+BN2+bias)
            pl.BlockSpec((HID, HID), const),               # m3 (conv3+BN3+bias)
            pl.BlockSpec((HID, 128), const),               # head Linear 1 (+bias)
            pl.BlockSpec((128, NOUT), const),              # head Linear 2
            pl.BlockSpec((1, NOUT), const),                # bh2 (-1e30 pad mask)
        ],
        out_specs=pl.BlockSpec((tb, NOUT), lambda i: (i, 0)),
        compiler_params=pltpu.CompilerParams(
            dimension_semantics=("parallel",),
            vmem_limit_bytes=32 * 1024 * 1024),
        cost_estimate=cost,
    )(x, w['m1'], w['m2'], w['m3'], w['wa'], w['w2'], w['bh2'])

    return probs[:bsz, :N_MOVES]


# --------------------------------------------------------------------------
# Parameter init + plain-JAX f32 reference (for validation only)
# --------------------------------------------------------------------------
def init_params(key):
    ks = jax.random.split(key, 16)
    p = {}
    p['w_c1'] = 0.10 * jax.random.normal(ks[0], (64, 12, 3, 3), jnp.float32)
    p['b_c1'] = 0.10 * jax.random.normal(ks[1], (64,), jnp.float32)
    p['w_c2'] = 0.05 * jax.random.normal(ks[2], (64, 64, 3, 3), jnp.float32)
    p['b_c2'] = 0.10 * jax.random.normal(ks[3], (64,), jnp.float32)
    p['w_c3'] = 0.05 * jax.random.normal(ks[4], (64, 64, 3, 3), jnp.float32)
    p['b_c3'] = 0.10 * jax.random.normal(ks[5], (64,), jnp.float32)
    for i, k in zip((1, 2, 3), (ks[6], ks[7], ks[8])):
        kk = jax.random.split(k, 4)
        p[f'bn{i}_gamma'] = 1.0 + 0.1 * jax.random.normal(kk[0], (64,), jnp.float32)
        p[f'bn{i}_beta'] = 0.1 * jax.random.normal(kk[1], (64,), jnp.float32)
        p[f'bn{i}_mean'] = 0.1 * jax.random.normal(kk[2], (64,), jnp.float32)
        p[f'bn{i}_var'] = jax.random.uniform(kk[3], (64,), jnp.float32, 0.5, 1.5)
    p['w_h1'] = 0.05 * jax.random.normal(ks[9], (128, 64 * 9 + 1), jnp.float32)
    p['b_h1'] = 0.10 * jax.random.normal(ks[10], (128,), jnp.float32)
    p['w_h2'] = 0.05 * jax.random.normal(ks[11], (81, 128), jnp.float32)
    p['b_h2'] = 0.10 * jax.random.normal(ks[12], (81,), jnp.float32)
    return p


def reference_forward(params, board_tensor, turn, eps=1e-5):
    """Plain-JAX f32 reference matching the PyTorch module (eval mode)."""
    bsz = board_tensor.shape[0]
    x = jnp.transpose(board_tensor, (0, 1, 4, 2, 3)).reshape(bsz, 12, 3, 3)
    x = x.astype(jnp.float32)

    def conv_bn_relu(x, w, b, g, beta, mean, var):
        y = jax.lax.conv_general_dilated(
            x, w, window_strides=(1, 1), padding='SAME',
            dimension_numbers=('NCHW', 'OIHW', 'NCHW'))
        y = y + b[None, :, None, None]
        scale = (g / jnp.sqrt(var + eps))[None, :, None, None]
        y = (y - mean[None, :, None, None]) * scale + beta[None, :, None, None]
        return jnp.maximum(y, 0.0)

    x = conv_bn_relu(x, params['w_c1'], params['b_c1'], params['bn1_gamma'],
                     params['bn1_beta'], params['bn1_mean'], params['bn1_var'])
    x = conv_bn_relu(x, params['w_c2'], params['b_c2'], params['bn2_gamma'],
                     params['bn2_beta'], params['bn2_mean'], params['bn2_var'])
    x = conv_bn_relu(x, params['w_c3'], params['b_c3'], params['bn3_gamma'],
                     params['bn3_beta'], params['bn3_mean'], params['bn3_var'])
    x = x.reshape(bsz, -1)
    t = turn.reshape(bsz, 1).astype(jnp.float32)
    x = jnp.concatenate([x, t], axis=1)
    z = jnp.maximum(x @ params['w_h1'].T + params['b_h1'], 0.0)
    logits = z @ params['w_h2'].T + params['b_h2']
    return jax.nn.softmax(logits, axis=-1)


if __name__ == "__main__":
    key = jax.random.PRNGKey(0)
    kp, kb, kt, kb2, kt2 = jax.random.split(key, 5)

    params = init_params(kp)
    weights = prepare_weights(params)          # one-time host preprocessing

    # small case: batch = 2 (single grid step)
    board = jax.random.normal(kb, (2, 2, 3, 3, 6), jnp.float32)
    turn = jax.random.randint(kt, (2,), 0, 2)
    probs = policy_net_forward(weights, board, turn)
    jax.block_until_ready(probs)

    assert probs.shape == (2, 81)
    assert bool(jnp.all(jnp.isfinite(probs)))
    assert bool(jnp.allclose(jnp.sum(probs, axis=-1), 1.0, atol=5e-3))
    ref = reference_forward(params, board, turn)
    assert bool(jnp.allclose(probs, ref, atol=2e-2)), \
        f"max abs diff = {float(jnp.max(jnp.abs(probs - ref)))}"

    # second case: batch = 20 (exercises the 2-step grid + batch padding path)
    board2 = jax.random.normal(kb2, (20, 2, 3, 3, 6), jnp.float32)
    turn2 = jax.random.randint(kt2, (20,), 0, 2)
    probs2 = policy_net_forward(weights, board2, turn2)
    jax.block_until_ready(probs2)

    assert probs2.shape == (20, 81)
    assert bool(jnp.all(jnp.isfinite(probs2)))
    assert bool(jnp.allclose(jnp.sum(probs2, axis=-1), 1.0, atol=5e-3))
    ref2 = reference_forward(params, board2, turn2)
    assert bool(jnp.allclose(probs2, ref2, atol=2e-2)), \
        f"max abs diff = {float(jnp.max(jnp.abs(probs2 - ref2)))}"

    print("KERNEL_OK")
</pallas_src>

<mosaic_0001>
module attributes {stable_mosaic.version = 11 : i64} {
  func.func @policy_kernel(%arg0: i32, %arg1: memref<16x128xbf16, #tpu.memory_space<vmem>>, %arg2: memref<128x640xbf16, #tpu.memory_space<vmem>>, %arg3: memref<640x640xbf16, #tpu.memory_space<vmem>>, %arg4: memref<640x640xbf16, #tpu.memory_space<vmem>>, %arg5: memref<640x128xbf16, #tpu.memory_space<vmem>>, %arg6: memref<128x128xbf16, #tpu.memory_space<vmem>>, %arg7: memref<1x128xf32, #tpu.memory_space<vmem>>, %arg8: memref<16x128xf32, #tpu.memory_space<vmem>>) attributes {dimension_semantics = [#tpu.dimension_semantics<parallel>], iteration_bounds = array<i64: 1>, scalar_prefetch = 0 : i64, scratch_operands = 0 : i64, tpu.core_type = #tpu.core_type<tc>, window_params = [{transform_indices = @transform_0, window_bounds = array<i64: 16, 128>}, {pipeline_mode = #tpu.pipeline_mode<synchronous>, transform_indices = @transform_1, window_bounds = array<i64: 128, 640>}, {pipeline_mode = #tpu.pipeline_mode<synchronous>, transform_indices = @transform_2, window_bounds = array<i64: 640, 640>}, {pipeline_mode = #tpu.pipeline_mode<synchronous>, transform_indices = @transform_3, window_bounds = array<i64: 640, 640>}, {pipeline_mode = #tpu.pipeline_mode<synchronous>, transform_indices = @transform_4, window_bounds = array<i64: 640, 128>}, {pipeline_mode = #tpu.pipeline_mode<synchronous>, transform_indices = @transform_5, window_bounds = array<i64: 128, 128>}, {pipeline_mode = #tpu.pipeline_mode<synchronous>, transform_indices = @transform_6, window_bounds = array<i64: 1, 128>}, {transform_indices = @transform_7, window_bounds = array<i64: 16, 128>}]} {
    %c0 = arith.constant 0 : index
    %c0_0 = arith.constant 0 : index
    %0 = vector.load %arg1[%c0, %c0_0] : memref<16x128xbf16, #tpu.memory_space<vmem>>, vector<16x128xbf16>
    %c0_1 = arith.constant 0 : index
    %c0_2 = arith.constant 0 : index
    %1 = vector.load %arg2[%c0_1, %c0_2] : memref<128x640xbf16, #tpu.memory_space<vmem>>, vector<128x640xbf16>
    %cst = arith.constant dense<0.000000e+00> : vector<16x640xf32>
    %2 = tpu.matmul %0, %1, %cst {dimension_numbers = #tpu.dot_dimension_numbers<[1], [0], [0], [1], [0, 0, 1, 1], [], []>} : vector<16x128xbf16>, vector<128x640xbf16>, vector<16x640xf32> -> vector<16x640xf32>
    %cst_3 = arith.constant 0.000000e+00 : f32
    %3 = vector.broadcast %cst_3 : f32 to vector<16x640xf32>
    %4 = arith.maximumf %2, %3 : vector<16x640xf32>
    %5 = arith.truncf %4 : vector<16x640xf32> to vector<16x640xbf16>
    %c0_4 = arith.constant 0 : index
    %c0_5 = arith.constant 0 : index
    %6 = vector.load %arg3[%c0_4, %c0_5] : memref<640x640xbf16, #tpu.memory_space<vmem>>, vector<640x640xbf16>
    %cst_6 = arith.constant dense<0.000000e+00> : vector<16x640xf32>
    %7 = tpu.matmul %5, %6, %cst_6 {dimension_numbers = #tpu.dot_dimension_numbers<[1], [0], [0], [1], [0, 0, 1, 1], [], []>} : vector<16x640xbf16>, vector<640x640xbf16>, vector<16x640xf32> -> vector<16x640xf32>
    %cst_7 = arith.constant 0.000000e+00 : f32
    %8 = vector.broadcast %cst_7 : f32 to vector<16x640xf32>
    %9 = arith.maximumf %7, %8 : vector<16x640xf32>
    %10 = arith.truncf %9 : vector<16x640xf32> to vector<16x640xbf16>
    %c0_8 = arith.constant 0 : index
    %c0_9 = arith.constant 0 : index
    %11 = vector.load %arg4[%c0_8, %c0_9] : memref<640x640xbf16, #tpu.memory_space<vmem>>, vector<640x640xbf16>
    %cst_10 = arith.constant dense<0.000000e+00> : vector<16x640xf32>
    %12 = tpu.matmul %10, %11, %cst_10 {dimension_numbers = #tpu.dot_dimension_numbers<[1], [0], [0], [1], [0, 0, 1, 1], [], []>} : vector<16x640xbf16>, vector<640x640xbf16>, vector<16x640xf32> -> vector<16x640xf32>
    %cst_11 = arith.constant 0.000000e+00 : f32
    %13 = vector.broadcast %cst_11 : f32 to vector<16x640xf32>
    %14 = arith.maximumf %12, %13 : vector<16x640xf32>
    %15 = arith.truncf %14 : vector<16x640xf32> to vector<16x640xbf16>
    %c0_12 = arith.constant 0 : index
    %c0_13 = arith.constant 0 : index
    %16 = vector.load %arg5[%c0_12, %c0_13] : memref<640x128xbf16, #tpu.memory_space<vmem>>, vector<640x128xbf16>
    %cst_14 = arith.constant dense<0.000000e+00> : vector<16x128xf32>
    %17 = tpu.matmul %15, %16, %cst_14 {dimension_numbers = #tpu.dot_dimension_numbers<[1], [0], [0], [1], [0, 0, 1, 1], [], []>} : vector<16x640xbf16>, vector<640x128xbf16>, vector<16x128xf32> -> vector<16x128xf32>
    %cst_15 = arith.constant 0.000000e+00 : f32
    %18 = vector.broadcast %cst_15 : f32 to vector<16x128xf32>
    %19 = arith.maximumf %17, %18 : vector<16x128xf32>
    %20 = arith.truncf %19 : vector<16x128xf32> to vector<16x128xbf16>
    %c0_16 = arith.constant 0 : index
    %c0_17 = arith.constant 0 : index
    %21 = vector.load %arg6[%c0_16, %c0_17] : memref<128x128xbf16, #tpu.memory_space<vmem>>, vector<128x128xbf16>
    %cst_18 = arith.constant dense<0.000000e+00> : vector<16x128xf32>
    %22 = tpu.matmul %20, %21, %cst_18 {dimension_numbers = #tpu.dot_dimension_numbers<[1], [0], [0], [1], [0, 0, 1, 1], [], []>} : vector<16x128xbf16>, vector<128x128xbf16>, vector<16x128xf32> -> vector<16x128xf32>
    %c0_19 = arith.constant 0 : index
    %c0_20 = arith.constant 0 : index
    %23 = vector.load %arg7[%c0_19, %c0_20] : memref<1x128xf32, #tpu.memory_space<vmem>>, vector<1x128xf32>
    %24 = vector.broadcast %23 : vector<1x128xf32> to vector<16x128xf32>
    %25 = arith.addf %22, %24 : vector<16x128xf32>
    %cst_21 = arith.constant dense<0xFF800000> : vector<16xf32>
    %26 = vector.multi_reduction <maximumf>, %25, %cst_21 [1] : vector<16x128xf32> to vector<16xf32>
    %27 = vector.shape_cast %26 : vector<16xf32> to vector<16x1xf32>
    %28 = vector.broadcast %27 : vector<16x1xf32> to vector<16x128xf32>
    %29 = arith.subf %25, %28 : vector<16x128xf32>
    %30 = math.exp %29 : vector<16x128xf32>
    %cst_22 = arith.constant dense<0.000000e+00> : vector<16xf32>
    %31 = vector.multi_reduction <add>, %30, %cst_22 [1] : vector<16x128xf32> to vector<16xf32>
    %32 = vector.shape_cast %31 : vector<16xf32> to vector<16x1xf32>
    %33 = tpu.reciprocal %32 {approx = true} : vector<16x1xf32> -> vector<16x1xf32>
    %34 = vector.broadcast %33 : vector<16x1xf32> to vector<16x128xf32>
    %35 = arith.mulf %30, %34 : vector<16x128xf32>
    %c0_23 = arith.constant 0 : index
    %c0_24 = arith.constant 0 : index
    %36 = vector.load %arg8[%c0_23, %c0_24] : memref<16x128xf32, #tpu.memory_space<vmem>>, vector<16x128xf32>
    tpu.vector_store %arg8[%c0_23, %c0_24], %35 {strides = array<i32>} : memref<16x128xf32, #tpu.memory_space<vmem>>, vector<16x128xf32>,
    return
  }
  func.func @transform_0(%arg0: i32) -> (i32, i32) {
    %c0_i32 = arith.constant 0 : i32
    %c0_i32_0 = arith.constant 0 : i32
    return %arg0, %c0_i32 : i32, i32
  }
  func.func @transform_1(%arg0: i32) -> (i32, i32) {
    %c0_i32 = arith.constant 0 : i32
    %c0_i32_0 = arith.constant 0 : i32
    %c0_i32_1 = arith.constant 0 : i32
    return %c0_i32, %c0_i32_0 : i32, i32
  }
  func.func @transform_2(%arg0: i32) -> (i32, i32) {
    %c0_i32 = arith.constant 0 : i32
    %c0_i32_0 = arith.constant 0 : i32
    %c0_i32_1 = arith.constant 0 : i32
    return %c0_i32, %c0_i32_0 : i32, i32
  }
  func.func @transform_3(%arg0: i32) -> (i32, i32) {
    %c0_i32 = arith.constant 0 : i32
    %c0_i32_0 = arith.constant 0 : i32
    %c0_i32_1 = arith.constant 0 : i32
    return %c0_i32, %c0_i32_0 : i32, i32
  }
  func.func @transform_4(%arg0: i32) -> (i32, i32) {
    %c0_i32 = arith.constant 0 : i32
    %c0_i32_0 = arith.constant 0 : i32
    %c0_i32_1 = arith.constant 0 : i32
    return %c0_i32, %c0_i32_0 : i32, i32
  }
  func.func @transform_5(%arg0: i32) -> (i32, i32) {
    %c0_i32 = arith.constant 0 : i32
    %c0_i32_0 = arith.constant 0 : i32
    %c0_i32_1 = arith.constant 0 : i32
    return %c0_i32, %c0_i32_0 : i32, i32
  }
  func.func @transform_6(%arg0: i32) -> (i32, i32) {
    %c0_i32 = arith.constant 0 : i32
    %c0_i32_0 = arith.constant 0 : i32
    %c0_i32_1 = arith.constant 0 : i32
    return %c0_i32, %c0_i32_0 : i32, i32
  }
  func.func @transform_7(%arg0: i32) -> (i32, i32) {
    %c0_i32 = arith.constant 0 : i32
    %c0_i32_0 = arith.constant 0 : i32
    return %arg0, %c0_i32 : i32, i32
  }
}

</mosaic_0001>

<bundles_post_ra>
// kernel: policy_net_forward.1
= control target key start
LH: loop header
LB: loop body
LE: loop exit
PB: predicated region body
PF: predicated region fallthrough
CT: control target
= control target key end

     0   :  { %12 = vsyncpa [#allocation3], 0  ;;  %s6172_s0 = inlined_call_operand.vmem [shape: bf16[16,128], index: 0, kind: input, shape index: {}]   ;;  %s6173_s1 = inlined_call_operand.hbm [shape: bf16[128,640], index: 1, kind: input, shape index: {}]   ;;  %s6174_s2 = inlined_call_operand.hbm [shape: bf16[640,640], index: 2, kind: input, shape index: {}]   ;;  %s6175_s3 = inlined_call_operand.hbm [shape: bf16[640,640], index: 3, kind: input, shape index: {}]   ;;  %s6176_s4 = inlined_call_operand.hbm [shape: bf16[640,128], index: 4, kind: input, shape index: {}]   ;;  %s6177_s5 = inlined_call_operand.vmem [shape: bf16[128,128], index: 5, kind: input, shape index: {}]   ;;  %s6178_s6 = inlined_call_operand.vmem [shape: f32[1,128], index: 6, kind: input, shape index: {}]   ;;  %s6179_s7 = inlined_call_operand.vmem [shape: f32[16,128], index: 7, kind: output, shape index: {}]  }
   0x1   :  { %13 = vsyncpa [#allocation5], 0 }
   0x2   :  { %14 = vsyncpa [#allocation8], 0  ;;  %s5962_s24 = smov [#allocation4]   ;;  %s5963_s26 = smov [#allocation2]  }
   0x3   :  { %s34_s25 = sshll.u32 %s5962_s24, 4  ;;  %s22_s27 = sshll.u32 %s5963_s26, 4  ;;  %s35_s25 = int_to_ptr.vmem [resolvable:$true] %s34_s25  ;;  %s23_s27 = int_to_ptr.vmem [resolvable:$true] %s22_s27 }
   0x4   :  { %s5884_s28 = scalar_lea.vmem %s35_s25, 25600  ;;  %p5889_p1 = scmp.lt.s32.totalorder %s35_s25, %s35_s25 }
   0x5   :  { %p5885_p0 = scmp.ne.s32.totalorder %s35_s25, %s5884_s28  ;;  %p5890_p2 = scmp.lt.s32.totalorder %s5884_s28, %s5884_s28 }
   0x7   :  { %p5891_p3 = por %p5890_p2, %p5889_p1 }
   0x9   :  { %p5892_p4 = pnand %p5891_p3, %p5885_p0 }
   0xb   :  { %5895 = shalt.err (!%p5892_p4)
}
   0xc   :  { %s5964_s29 = smov 320   ;;  %s5965_s30 = smov 20  }
   0xd   :  { %40 = dma.hbm_to_vmem [thread:$0]  %s6174_s2, 25600, %s35_s25, [#allocation5], %s5964_s29, %s5964_s29, %s5965_s30  }
   0xe   :  { %s5904_s10 = scalar_lea.vmem %s23_s27, 5120  ;;  %p5909_p6 = scmp.lt.s32.totalorder %s23_s27, %s23_s27 }
   0xf   :  { %p5905_p5 = scmp.ne.s32.totalorder %s23_s27, %s5904_s10  ;;  %p5910_p7 = scmp.lt.s32.totalorder %s5904_s10, %s5904_s10 }
  0x11   :  { %p5911_p8 = por %p5910_p7, %p5909_p6 }
  0x13   :  { %p5912_p9 = pnand %p5911_p8, %p5905_p5 }
  0x15   :  { %5915 = shalt.err (!%p5912_p9)
}
  0x16   :  { %28 = dma.hbm_to_vmem [thread:$0]  %s6173_s1, 5120, %s23_s27, [#allocation3], %s5964_s29, %s5964_s29, %s5965_s30  }
  0x17   :  { %s5966_s13 = smov [#allocation6]   ;;  %s5967_s15 = smov [#allocation7]  }
  0x18   :  { %s46_s14 = sshll.u32 %s5966_s13, 4  ;;  %s58_s16 = sshll.u32 %s5967_s15, 4  ;;  %s47_s14 = int_to_ptr.vmem [resolvable:$true] %s46_s14  ;;  %s59_s16 = int_to_ptr.vmem [resolvable:$true] %s58_s16 }
  0x19   :  { %s5924_s17 = scalar_lea.vmem %s47_s14, 25600  ;;  %p5929_p11 = scmp.lt.s32.totalorder %s47_s14, %s47_s14 }
  0x1a   :  { %p5925_p10 = scmp.ne.s32.totalorder %s47_s14, %s5924_s17  ;;  %p5930_p12 = scmp.lt.s32.totalorder %s5924_s17, %s5924_s17 }
  0x1c   :  { %p5931_p13 = por %p5930_p12, %p5929_p11 }
  0x1e   :  { %p5932_p0 = pnand %p5931_p13, %p5925_p10 }
  0x20   :  { %5935 = shalt.err (!%p5932_p0)
}
  0x21   :  { %52 = dma.hbm_to_vmem [thread:$0]  %s6175_s3, 25600, %s47_s14, [#allocation5], %s5964_s29, %s5964_s29, %s5965_s30  }
  0x22   :  { %s5944_s19 = scalar_lea.vmem %s59_s16, 5120  ;;  %p5949_p2 = scmp.lt.s32.totalorder %s59_s16, %s59_s16 }
  0x23   :  { %p5945_p1 = scmp.ne.s32.totalorder %s59_s16, %s5944_s19  ;;  %p5950_p3 = scmp.lt.s32.totalorder %s5944_s19, %s5944_s19 }
  0x25   :  { %p5951_p4 = por %p5950_p3, %p5949_p2 }
  0x27   :  { %p5952_p5 = pnand %p5951_p4, %p5945_p1 }
  0x29   :  { %5955 = shalt.err (!%p5952_p5)
}
  0x2a   :  { %s5968_s1 = smov 64   ;;  %s5969_s20 = smov 4  }
  0x2b   :  { %64 = dma.hbm_to_vmem [thread:$0]  %s6176_s4, 5120, %s59_s16, [#allocation8], %s5968_s1, %s5968_s1, %s5969_s20  }
  0x2c   :  { %5956 = dma.done.wait [#allocation3], 5120  }
  0x2d   :  { %5957 = vsyncadd [#allocation3], 4294962176 }
  0x2e   :  { %5958 = dma.done.wait [#allocation5], 51200  }
  0x2f   :  { %5959 = vsyncadd [#allocation5], 4294916096 }
  0x30   :  { %5960 = dma.done.wait [#allocation8], 5120  }
  0x31   :  { %5961 = vsyncadd [#allocation8], 4294962176  ;;  %v5970_v0 = vmov 0   ;;  %v5203_v1 = vld [vmem:[#allocation2 + $0x11c] ss:$20 sps:$4 sm:$0xff]   ;;  %v6030_v33 = vld [vmem:[%s6172_s0] sm:$0xff]  }
  0x32   :  { %378 = vmatprep.mubr.bf16.mxu0 %v5970_v0  ;;  %421 = vmatprep.mubr.bf16.mxu1 %v5970_v0  ;;  %v5205_v2 = vld [vmem:[#allocation2 + $0x124] ss:$20 sps:$4 sm:$0xff]   ;;  %v5208_v4 = vld [vmem:[#allocation2 + $0x120] ss:$20 sps:$4 sm:$0xff]   ;;  %v5211_v6 = vld [vmem:[#allocation2 + $0xfc] ss:$20 sps:$4 sm:$0xff]  }
  0x33   :  { %346 = vmatprep.subr.bf16.mxu0 %v5203_v1  ;;  %v5207_v3 = vld [vmem:[#allocation2 + $0x118] ss:$20 sps:$4 sm:$0xff]   ;;  %389 = vmatprep.subr.bf16.mxu1 %v5205_v2  ;;  %v5209_v5 = vld [vmem:[#allocation2 + $0xf4] ss:$20 sps:$4 sm:$0xff]   ;;  %v5213_v7 = vld [vmem:[#allocation2 + $0xf0] ss:$20 sps:$4 sm:$0xff]  }
  0x34   :  { %347 = vmatpush1.bf16.msra.mxu0 %v5207_v3  ;;  %390 = vmatpush1.bf16.msra.mxu1 %v5208_v4  ;;  %v5214_v8 = vld [vmem:[#allocation2 + $0xf8] ss:$20 sps:$4 sm:$0xff]   ;;  %v5217_v10 = vld [vmem:[#allocation2 + $0xd4] ss:$20 sps:$4 sm:$0xff]   ;;  %v5220_v12 = vld [vmem:[#allocation2 + $0xd0] ss:$20 sps:$4 sm:$0xff]  }
  0x35   :  { %348 = vmatprep.subr.bf16.mxu0 %v5209_v5  ;;  %391 = vmatprep.subr.bf16.mxu1 %v5211_v6  ;;  %v5215_v9 = vld [vmem:[#allocation2 + $0xcc] ss:$20 sps:$4 sm:$0xff]   ;;  %v5219_v11 = vld [vmem:[#allocation2 + $0xc8] ss:$20 sps:$4 sm:$0xff]   ;;  %v5221_v13 = vld [vmem:[#allocation2 + $0xa4] ss:$20 sps:$4 sm:$0xff]  }
  0x36   :  { %v5223_v14 = vld [vmem:[#allocation2 + $0xac] ss:$20 sps:$4 sm:$0xff]   ;;  %v5226_v16 = vld [vmem:[#allocation2 + $0xa8] ss:$20 sps:$4 sm:$0xff]   ;;  %v5229_v18 = vld [vmem:[#allocation2 + $0x84] ss:$20 sps:$4 sm:$0xff]  }
  0x37   :  { %v5225_v15 = vld [vmem:[#allocation2 + $0xa0] ss:$20 sps:$4 sm:$0xff]   ;;  %v5227_v17 = vld [vmem:[#allocation2 + $0x7c] ss:$20 sps:$4 sm:$0xff]   ;;  %v5231_v19 = vld [vmem:[#allocation2 + $0x78] ss:$20 sps:$4 sm:$0xff]  }
  0x38   :  { %349 = vmatpush1.bf16.msra.mxu0 %v5213_v7  ;;  %392 = vmatpush1.bf16.msra.mxu1 %v5214_v8  ;;  %v5232_v20 = vld [vmem:[#allocation2 + $0x80] ss:$20 sps:$4 sm:$0xff]   ;;  %v5235_v22 = vld [vmem:[#allocation2 + $0x5c] ss:$20 sps:$4 sm:$0xff]   ;;  %v5238_v24 = vld [vmem:[#allocation2 + $0x58] ss:$20 sps:$4 sm:$0xff]  }
  0x39   :  { %350 = vmatprep.subr.bf16.mxu0 %v5215_v9  ;;  %393 = vmatprep.subr.bf16.mxu1 %v5217_v10  ;;  %v5233_v21 = vld [vmem:[#allocation2 + $0x54] ss:$20 sps:$4 sm:$0xff]   ;;  %v5237_v23 = vld [vmem:[#allocation2 + $0x50] ss:$20 sps:$4 sm:$0xff]   ;;  %v5239_v25 = vld [vmem:[#allocation2 + $0x2c] ss:$20 sps:$4 sm:$0xff]  }
  0x3a   :  { %v5241_v26 = vld [vmem:[#allocation2 + $0x34] ss:$20 sps:$4 sm:$0xff]   ;;  %v5244_v28 = vld [vmem:[#allocation2 + $0x30] ss:$20 sps:$4 sm:$0xff]   ;;  %v5247_v30 = vld [vmem:[#allocation2 + $0xc] ss:$20 sps:$4 sm:$0xff]  }
  0x3b   :  { %v5243_v27 = vld [vmem:[#allocation2 + $0x28] ss:$20 sps:$4 sm:$0xff]   ;;  %v5245_v29 = vld [vmem:[#allocation2 + $0x4] ss:$20 sps:$4 sm:$0xff]   ;;  %v5249_v31 = vld [vmem:[#allocation2] ss:$20 sps:$4 sm:$0xff]  }
  0x3c   :  { %351 = vmatpush1.bf16.msra.mxu0 %v5219_v11  ;;  %394 = vmatpush1.bf16.msra.mxu1 %v5220_v12  ;;  %v5250_v32 = vld [vmem:[#allocation2 + $0x8] ss:$20 sps:$4 sm:$0xff]   ;;  %v5971_v36 = vmov 0.0   ;;  %v5260_v37 = vld [vmem:[#allocation4 + $0x118] ss:$20 sps:$4 sm:$0xff]   ;;  %vm5972_vm0 = vmmov 0  }
  0x3d   :  { %352 = vmatprep.subr.bf16.mxu0 %v5221_v13  ;;  %395 = vmatprep.subr.bf16.mxu1 %v5223_v14  ;;  %v5262_v34 = vld [vmem:[#allocation4 + $0x11c] ss:$20 sps:$4 sm:$0xff]   ;;  %v5268_v38 = vld [vmem:[#allocation4 + $0xf4] ss:$20 sps:$4 sm:$0xff]   ;;  %v5274_v41 = vld [vmem:[#allocation4 + $0xcc] ss:$20 sps:$4 sm:$0xff]  }
  0x3e   :  { %v5252_v35 = vld [vmem:[#allocation2 + $0x128] ss:$20 sps:$4 sm:$0xff]   ;;  %v5253_v39 = vld [vmem:[#allocation2 + $0x100] ss:$20 sps:$4 sm:$0xff]   ;;  %v5266_v40 = vld [vmem:[#allocation4 + $0xf0] ss:$20 sps:$4 sm:$0xff]  }
  0x3f   :  { %v5254_v42 = vld [vmem:[#allocation2 + $0xd8] ss:$20 sps:$4 sm:$0xff]   ;;  %v5272_v43 = vld [vmem:[#allocation4 + $0xc8] ss:$20 sps:$4 sm:$0xff]   ;;  %v5255_v45 = vld [vmem:[#allocation2 + $0xb0] ss:$20 sps:$4 sm:$0xff]  }
  0x40   :  { %353 = vmatpush1.bf16.msra.mxu0 %v5225_v15  ;;  %396 = vmatpush1.bf16.msra.mxu1 %v5226_v16  ;;  %v5280_v44 = vld [vmem:[#allocation4 + $0xa4] ss:$20 sps:$4 sm:$0xff]   ;;  %v5278_v46 = vld [vmem:[#allocation4 + $0xa0] ss:$20 sps:$4 sm:$0xff]   ;;  %v5286_v47 = vld [vmem:[#allocation4 + $0x7c] ss:$20 sps:$4 sm:$0xff]  }
  0x41   :  { %354 = vmatprep.subr.bf16.mxu0 %v5227_v17  ;;  %397 = vmatprep.subr.bf16.mxu1 %v5229_v18  ;;  %v5256_v48 = vld [vmem:[#allocation2 + $0x88] ss:$20 sps:$4 sm:$0xff]   ;;  %v5284_v49 = vld [vmem:[#allocation4 + $0x78] ss:$20 sps:$4 sm:$0xff]   ;;  %v5257_v51 = vld [vmem:[#allocation2 + $0x60] ss:$20 sps:$4 sm:$0xff]  }
  0x42   :  { %v5292_v50 = vld [vmem:[#allocation4 + $0x54] ss:$20 sps:$4 sm:$0xff]   ;;  %v5290_v52 = vld [vmem:[#allocation4 + $0x50] ss:$20 sps:$4 sm:$0xff]   ;;  %v5298_v53 = vld [vmem:[#allocation4 + $0x2c] ss:$20 sps:$4 sm:$0xff]  }
  0x43   :  { %v5258_v54 = vld [vmem:[#allocation2 + $0x38] ss:$20 sps:$4 sm:$0xff]   ;;  %v5296_v55 = vld [vmem:[#allocation4 + $0x28] ss:$20 sps:$4 sm:$0xff]   ;;  %v5259_v57 = vld [vmem:[#allocation2 + $0x10] ss:$20 sps:$4 sm:$0xff]  }
  0x44   :  { %355 = vmatpush1.bf16.msra.mxu0 %v5231_v19  ;;  %398 = vmatpush1.bf16.msra.mxu1 %v5232_v20  ;;  %v5304_v56 = vld [vmem:[#allocation4 + $0x4] ss:$20 sps:$4 sm:$0xff]   ;;  %v5265_v58 = vld [vmem:[#allocation4 + $0x39c] ss:$20 sps:$4 sm:$0xff]   ;;  %v5302_v59 = vld [vmem:[#allocation4] ss:$20 sps:$4 sm:$0xff]  }
  0x45   :  { %356 = vmatprep.subr.bf16.mxu0 %v5233_v21  ;;  %399 = vmatprep.subr.bf16.mxu1 %v5235_v22  ;;  %v5310_v60 = vld [vmem:[#allocation4 + $0x25c] ss:$20 sps:$4 sm:$0xff]   ;;  %v5263_v61 = vld [vmem:[#allocation4 + $0x398] ss:$20 sps:$4 sm:$0xff]   ;;  %v5271_v62 = vld [vmem:[#allocation4 + $0x374] ss:$20 sps:$4 sm:$0xff]  }
  0x46   :  { %v5308_v63 = vld [vmem:[#allocation4 + $0x258] ss:$20 sps:$4 sm:$0xff]   ;;  %v5269_v1 = vld [vmem:[#allocation4 + $0x370] ss:$20 sps:$4 sm:$0xff]   ;;  %v5316_v2 = vld [vmem:[#allocation4 + $0x234] ss:$20 sps:$4 sm:$0xff]  }
  0x47   :  { %v5277_v3 = vld [vmem:[#allocation4 + $0x34c] ss:$20 sps:$4 sm:$0xff]   ;;  %v5314_v4 = vld [vmem:[#allocation4 + $0x230] ss:$20 sps:$4 sm:$0xff]   ;;  %v5275_v6 = vld [vmem:[#allocation4 + $0x348] ss:$20 sps:$4 sm:$0xff]  }
  0x48   :  { %357 = vmatpush1.bf16.msra.mxu0 %v5237_v23  ;;  %400 = vmatpush1.bf16.msra.mxu1 %v5238_v24  ;;  %v5322_v5 = vld [vmem:[#allocation4 + $0x20c] ss:$20 sps:$4 sm:$0xff]   ;;  %v5283_v7 = vld [vmem:[#allocation4 + $0x324] ss:$20 sps:$4 sm:$0xff]   ;;  %v5320_v8 = vld [vmem:[#allocation4 + $0x208] ss:$20 sps:$4 sm:$0xff]  }
  0x49   :  { %358 = vmatprep.subr.bf16.mxu0 %v5239_v25  ;;  %401 = vmatprep.subr.bf16.mxu1 %v5241_v26  ;;  %v5328_v9 = vld [vmem:[#allocation4 + $0x1e4] ss:$20 sps:$4 sm:$0xff]   ;;  %v5281_v10 = vld [vmem:[#allocation4 + $0x320] ss:$20 sps:$4 sm:$0xff]   ;;  %v5289_v11 = vld [vmem:[#allocation4 + $0x2fc] ss:$20 sps:$4 sm:$0xff]  }
  0x4a   :  { %v5326_v12 = vld [vmem:[#allocation4 + $0x1e0] ss:$20 sps:$4 sm:$0xff]   ;;  %v5334_v13 = vld [vmem:[#allocation4 + $0x1bc] ss:$20 sps:$4 sm:$0xff]   ;;  %v5287_v14 = vld [vmem:[#allocation4 + $0x2f8] ss:$20 sps:$4 sm:$0xff]  }
  0x4b   :  { %v5295_v15 = vld [vmem:[#allocation4 + $0x2d4] ss:$20 sps:$4 sm:$0xff]   ;;  %v5332_v16 = vld [vmem:[#allocation4 + $0x1b8] ss:$20 sps:$4 sm:$0xff]   ;;  %v5293_v18 = vld [vmem:[#allocation4 + $0x2d0] ss:$20 sps:$4 sm:$0xff]  }
  0x4c   :  { %359 = vmatpush1.bf16.msra.mxu0 %v5243_v27  ;;  %402 = vmatpush1.bf16.msra.mxu1 %v5244_v28  ;;  %v5340_v17 = vld [vmem:[#allocation4 + $0x194] ss:$20 sps:$4 sm:$0xff]   ;;  %v5301_v19 = vld [vmem:[#allocation4 + $0x2ac] ss:$20 sps:$4 sm:$0xff]   ;;  %v5338_v20 = vld [vmem:[#allocation4 + $0x190] ss:$20 sps:$4 sm:$0xff]  }
  0x4d   :  { %360 = vmatprep.subr.bf16.mxu0 %v5245_v29  ;;  %403 = vmatprep.subr.bf16.mxu1 %v5247_v30  ;;  %v5299_v21 = vld [vmem:[#allocation4 + $0x2a8] ss:$20 sps:$4 sm:$0xff]   ;;  %v5307_v22 = vld [vmem:[#allocation4 + $0x284] ss:$20 sps:$4 sm:$0xff]   ;;  %v5305_v23 = vld [vmem:[#allocation4 + $0x280] ss:$20 sps:$4 sm:$0xff]  }
  0x4e   :  { %v5313_v24 = vld [vmem:[#allocation4 + $0x4dc] ss:$20 sps:$4 sm:$0xff]   ;;  %v5311_v25 = vld [vmem:[#allocation4 + $0x4d8] ss:$20 sps:$4 sm:$0xff]   ;;  %v5319_v26 = vld [vmem:[#allocation4 + $0x4b4] ss:$20 sps:$4 sm:$0xff]  }
  0x4f   :  { %v5317_v27 = vld [vmem:[#allocation4 + $0x4b0] ss:$20 sps:$4 sm:$0xff]   ;;  %v5346_v28 = vld [vmem:[#allocation4 + $0x16c] ss:$20 sps:$4 sm:$0xff]   ;;  %v5344_v30 = vld [vmem:[#allocation4 + $0x168] ss:$20 sps:$4 sm:$0xff]  }
  0x50   :  { %361 = vmatpush1.bf16.msra.mxu0 %v5249_v31  ;;  %404 = vmatpush1.bf16.msra.mxu1 %v5250_v32  ;;  %v5325_v29 = vld [vmem:[#allocation4 + $0x48c] ss:$20 sps:$4 sm:$0xff]   ;;  %v5323_v31 = vld [vmem:[#allocation4 + $0x488] ss:$20 sps:$4 sm:$0xff]   ;;  %v5352_v32 = vld [vmem:[#allocation4 + $0x144] ss:$20 sps:$4 sm:$0xff]  }
  0x51   :  { %5092 = vmatprep.subr.bf16.mxu0 %v5971_v36  ;;  %1768 = vmatprep.subr.bf16.mxu1 %v5262_v34  ;;  %v5350_v34 = vld [vmem:[#allocation4 + $0x140] ss:$20 sps:$4 sm:$0xff]  }
  0x53   :  { %379 = vmatmul.mubr.bf16.vlgmr.msra.gmra.mxu0 %v6030_v33  ;;  %422 = vmatmul.mubr.bf16.vlgmr.msra.gmra.mxu1 %v6030_v33 }
  0x54   :  { %5093 = vmatpush3.bf16.msra.mxu0 %v5252_v35  ;;  %5108 = vmatprep.mubr.msk.bf16.mxu0 %vm5972_vm0, %v5971_v36  ;;  %v5329_v35 = vld [vmem:[#allocation4 + $0x460] ss:$20 sps:$4 sm:$0xff]  }
  0x55   :  { %5094 = vmatprep.subr.bf16.mxu0 %v5971_v36  ;;  %1769 = vmatpush1.bf16.msra.mxu1 %v5260_v37  ;;  %v5358_v37 = vld [vmem:[#allocation4 + $0x61c] ss:$20 sps:$4 sm:$0xff]  }
  0x56   :  { %1770 = vmatprep.subr.bf16.mxu1 %v5268_v38  ;;  %v5337_v38 = vld [vmem:[#allocation4 + $0x43c] ss:$20 sps:$4 sm:$0xff]  }
  0x58   :  { %5095 = vmatpush3.bf16.msra.mxu0 %v5253_v39  ;;  %v5335_v39 = vld [vmem:[#allocation4 + $0x438] ss:$20 sps:$4 sm:$0xff]  }
  0x59   :  { %5096 = vmatprep.subr.bf16.mxu0 %v5971_v36  ;;  %1771 = vmatpush1.bf16.msra.mxu1 %v5266_v40  ;;  %v5343_v40 = vld [vmem:[#allocation4 + $0x414] ss:$20 sps:$4 sm:$0xff]  }
  0x5a   :  { %1772 = vmatprep.subr.bf16.mxu1 %v5274_v41  ;;  %v5341_v41 = vld [vmem:[#allocation4 + $0x410] ss:$20 sps:$4 sm:$0xff]  }
  0x5c   :  { %5097 = vmatpush3.bf16.msra.mxu0 %v5254_v42  ;;  %v5349_v42 = vld [vmem:[#allocation4 + $0x3ec] ss:$20 sps:$4 sm:$0xff]  }
  0x5d   :  { %5098 = vmatprep.subr.bf16.mxu0 %v5971_v36  ;;  %1773 = vmatpush1.bf16.msra.mxu1 %v5272_v43  ;;  %v5347_v43 = vld [vmem:[#allocation4 + $0x3e8] ss:$20 sps:$4 sm:$0xff]  }
  0x5e   :  { %1774 = vmatprep.subr.bf16.mxu1 %v5280_v44  ;;  %v5355_v44 = vld [vmem:[#allocation4 + $0x3c4] ss:$20 sps:$4 sm:$0xff]  }
  0x60   :  { %5099 = vmatpush3.bf16.msra.mxu0 %v5255_v45  ;;  %v5353_v45 = vld [vmem:[#allocation4 + $0x3c0] ss:$20 sps:$4 sm:$0xff]  }
  0x61   :  { %5100 = vmatprep.subr.bf16.mxu0 %v5971_v36  ;;  %1775 = vmatpush1.bf16.msra.mxu1 %v5278_v46  ;;  %v5361_v46 = vld [vmem:[#allocation4 + $0x124] ss:$20 sps:$4 sm:$0xff]  }
  0x62   :  { %1776 = vmatprep.subr.bf16.mxu1 %v5286_v47 }
  0x64   :  { %5101 = vmatpush3.bf16.msra.mxu0 %v5256_v48 }
  0x65   :  { %5102 = vmatprep.subr.bf16.mxu0 %v5971_v36  ;;  %1777 = vmatpush1.bf16.msra.mxu1 %v5284_v49 }
  0x66   :  { %1778 = vmatprep.subr.bf16.mxu1 %v5292_v50 }
  0x68   :  { %5103 = vmatpush3.bf16.msra.mxu0 %v5257_v51 }
  0x69   :  { %5104 = vmatprep.subr.bf16.mxu0 %v5971_v36  ;;  %1779 = vmatpush1.bf16.msra.mxu1 %v5290_v52 }
  0x6a   :  { %1780 = vmatprep.subr.bf16.mxu1 %v5298_v53 }
  0x6c   :  { %5105 = vmatpush3.bf16.msra.mxu0 %v5258_v54 }
  0x6d   :  { %5106 = vmatprep.subr.bf16.mxu0 %v5971_v36  ;;  %1781 = vmatpush1.bf16.msra.mxu1 %v5296_v55 }
  0x6e   :  { %1782 = vmatprep.subr.bf16.mxu1 %v5304_v56 }
  0x70   :  { %5107 = vmatpush3.bf16.msra.mxu0 %v5259_v57 }
  0x71   :  { %1811 = vmatprep.subr.bf16.mxu0 %v5265_v58  ;;  %1783 = vmatpush1.bf16.msra.mxu1 %v5302_v59 }
  0x72   :  { %1784 = vmatprep.subr.bf16.mxu1 %v5310_v60 }
  0x73   :  { %5109 = vmatmul.mubr.bf16.vlgmr.msra.gmra.mxu0 %v6030_v33  ;;  %v5331_v33 = vld [vmem:[#allocation4 + $0x464] ss:$20 sps:$4 sm:$0xff]  }
  0x74   :  { %1812 = vmatpush1.bf16.msra.mxu0 %v5263_v61 }
  0x75   :  { %1813 = vmatprep.subr.bf16.mxu0 %v5271_v62  ;;  %1785 = vmatpush2.bf16.msra.mxu1 %v5308_v63  ;;  %v5356_v62 = vld [vmem:[#allocation4 + $0x618] ss:$20 sps:$4 sm:$0xff]   ;;  %v5359_v63 = vld [vmem:[#allocation4 + $0x120] ss:$20 sps:$4 sm:$0xff]  }
  0x76   :  { %1786 = vmatprep.subr.bf16.mxu1 %v5316_v2 }
  0x78   :  { %1814 = vmatpush1.bf16.msra.mxu0 %v5269_v1 }
  0x79   :  { %1815 = vmatprep.subr.bf16.mxu0 %v5277_v3  ;;  %1787 = vmatpush2.bf16.msra.mxu1 %v5314_v4  ;;  %v5364_v3 = vld [vmem:[#allocation4 + $0x5f4] ss:$20 sps:$4 sm:$0xff]  }
  0x7a   :  { %1788 = vmatprep.subr.bf16.mxu1 %v5322_v5 }
  0x7c   :  { %1816 = vmatpush1.bf16.msra.mxu0 %v5275_v6  ;;  %v5367_v6 = vld [vmem:[#allocation4 + $0xfc] ss:$20 sps:$4 sm:$0xff]  }
  0x7d   :  { %1817 = vmatprep.subr.bf16.mxu0 %v5283_v7  ;;  %1789 = vmatpush2.bf16.msra.mxu1 %v5320_v8  ;;  %v5362_v8 = vld [vmem:[#allocation4 + $0x5f0] ss:$20 sps:$4 sm:$0xff]  }
  0x7e   :  { %1790 = vmatprep.subr.bf16.mxu1 %v5328_v9  ;;  %v5365_v9 = vld [vmem:[#allocation4 + $0xf8] ss:$20 sps:$4 sm:$0xff]  }
  0x80   :  { %1818 = vmatpush1.bf16.msra.mxu0 %v5281_v10  ;;  %v5370_v10 = vld [vmem:[#allocation4 + $0x5cc] ss:$20 sps:$4 sm:$0xff]  }
  0x81   :  { %1819 = vmatprep.subr.bf16.mxu0 %v5289_v11  ;;  %1791 = vmatpush2.bf16.msra.mxu1 %v5326_v12  ;;  %v5373_v11 = vld [vmem:[#allocation4 + $0xd4] ss:$20 sps:$4 sm:$0xff]  }
  0x82   :  { %1792 = vmatprep.subr.bf16.mxu1 %v5334_v13  ;;  %v5368_v12 = vld [vmem:[#allocation4 + $0x5c8] ss:$20 sps:$4 sm:$0xff]   ;;  %v5371_v13 = vld [vmem:[#allocation4 + $0xd0] ss:$20 sps:$4 sm:$0xff]  }
  0x84   :  { %1820 = vmatpush1.bf16.msra.mxu0 %v5287_v14  ;;  %v5376_v14 = vld [vmem:[#allocation4 + $0x5a4] ss:$20 sps:$4 sm:$0xff]  }
  0x85   :  { %1821 = vmatprep.subr.bf16.mxu0 %v5295_v15  ;;  %1793 = vmatpush2.bf16.msra.mxu1 %v5332_v16  ;;  %v5379_v15 = vld [vmem:[#allocation4 + $0xac] ss:$20 sps:$4 sm:$0xff]  }
  0x86   :  { %1794 = vmatprep.subr.bf16.mxu1 %v5340_v17  ;;  %v5374_v16 = vld [vmem:[#allocation4 + $0x5a0] ss:$20 sps:$4 sm:$0xff]   ;;  %v5377_v17 = vld [vmem:[#allocation4 + $0xa8] ss:$20 sps:$4 sm:$0xff]  }
  0x88   :  { %1822 = vmatpush1.bf16.msra.mxu0 %v5293_v18  ;;  %v5382_v18 = vld [vmem:[#allocation4 + $0x57c] ss:$20 sps:$4 sm:$0xff]  }
  0x89   :  { %1823 = vmatprep.subr.bf16.mxu0 %v5301_v19  ;;  %1795 = vmatpush2.bf16.msra.mxu1 %v5338_v20  ;;  %v5385_v19 = vld [vmem:[#allocation4 + $0x84] ss:$20 sps:$4 sm:$0xff]  }
  0x8a   :  { %1796 = vmatprep.subr.bf16.mxu1 %v5346_v28  ;;  %v5380_v20 = vld [vmem:[#allocation4 + $0x578] ss:$20 sps:$4 sm:$0xff]   ;;  %v5392_v28 = vld [vmem:[#allocation4 + $0x528] ss:$20 sps:$4 sm:$0xff]  }
  0x8c   :  { %1824 = vmatpush1.bf16.msra.mxu0 %v5299_v21  ;;  %v5383_v21 = vld [vmem:[#allocation4 + $0x80] ss:$20 sps:$4 sm:$0xff]  }
  0x8d   :  { %1825 = vmatprep.subr.bf16.mxu0 %v5307_v22  ;;  %1797 = vmatpush2.bf16.msra.mxu1 %v5344_v30  ;;  %v5388_v22 = vld [vmem:[#allocation4 + $0x554] ss:$20 sps:$4 sm:$0xff]  }
  0x8e   :  { %1798 = vmatprep.subr.bf16.mxu1 %v5352_v32 }
  0x90   :  { %1826 = vmatpush1.bf16.msra.mxu0 %v5305_v23  ;;  %v5391_v23 = vld [vmem:[#allocation4 + $0x5c] ss:$20 sps:$4 sm:$0xff]  }
  0x91   :  { %1827 = vmatprep.subr.bf16.mxu0 %v5313_v24  ;;  %1799 = vmatpush2.bf16.msra.mxu1 %v5350_v34  ;;  %v5386_v24 = vld [vmem:[#allocation4 + $0x550] ss:$20 sps:$4 sm:$0xff]   ;;  %v5398_v34 = vld [vmem:[#allocation4 + $0x500] ss:$20 sps:$4 sm:$0xff]  }
  0x92   :  { %1854 = vmatprep.subr.bf16.mxu1 %v5358_v37 }
  0x94   :  { %1828 = vmatpush2.bf16.msra.mxu0 %v5311_v25  ;;  %v5389_v25 = vld [vmem:[#allocation4 + $0x58] ss:$20 sps:$4 sm:$0xff]  }
  0x95   :  { %1829 = vmatprep.subr.bf16.mxu0 %v5319_v26  ;;  %v5394_v26 = vld [vmem:[#allocation4 + $0x52c] ss:$20 sps:$4 sm:$0xff]  }
  0x98   :  { %1830 = vmatpush2.bf16.msra.mxu0 %v5317_v27  ;;  %v5397_v27 = vld [vmem:[#allocation4 + $0x34] ss:$20 sps:$4 sm:$0xff]  }
  0x99   :  { %1831 = vmatprep.subr.bf16.mxu0 %v5325_v29  ;;  %v5395_v29 = vld [vmem:[#allocation4 + $0x30] ss:$20 sps:$4 sm:$0xff]  }
  0x9c   :  { %1832 = vmatpush2.bf16.msra.mxu0 %v5323_v31  ;;  %v5400_v31 = vld [vmem:[#allocation4 + $0x504] ss:$20 sps:$4 sm:$0xff]  }
  0x9d   :  { %1833 = vmatprep.subr.bf16.mxu0 %v5331_v33  ;;  %v5403_v33 = vld [vmem:[#allocation4 + $0xc] ss:$20 sps:$4 sm:$0xff]  }
  0xa0   :  { %1834 = vmatpush2.bf16.msra.mxu0 %v5329_v35  ;;  %v5401_v35 = vld [vmem:[#allocation4 + $0x8] ss:$20 sps:$4 sm:$0xff]  }
  0xa1   :  { %1835 = vmatprep.subr.bf16.mxu0 %v5337_v38  ;;  %v5406_v38 = vld [vmem:[#allocation4 + $0x264] ss:$20 sps:$4 sm:$0xff]  }
  0xa4   :  { %1836 = vmatpush2.bf16.msra.mxu0 %v5335_v39  ;;  %v5409_v39 = vld [vmem:[#allocation4 + $0x3a4] ss:$20 sps:$4 sm:$0xff]  }
  0xa5   :  { %1837 = vmatprep.subr.bf16.mxu0 %v5343_v40 }
  0xa8   :  { %1838 = vmatpush2.bf16.msra.mxu0 %v5341_v41 }
  0xa9   :  { %1839 = vmatprep.subr.bf16.mxu0 %v5349_v42 }
  0xac   :  { %1840 = vmatpush2.bf16.msra.mxu0 %v5347_v43  ;;  %v5404_v43 = vld [vmem:[#allocation4 + $0x260] ss:$20 sps:$4 sm:$0xff]  }
  0xad   :  { %1841 = vmatprep.subr.bf16.mxu0 %v5355_v44  ;;  %v5407_v44 = vld [vmem:[#allocation4 + $0x3a0] ss:$20 sps:$4 sm:$0xff]  }
  0xb0   :  { %1842 = vmatpush2.bf16.msra.mxu0 %v5353_v45  ;;  %v5412_v45 = vld [vmem:[#allocation4 + $0x23c] ss:$20 sps:$4 sm:$0xff]  }
  0xb1   :  { %1897 = vmatprep.subr.bf16.mxu0 %v5361_v46  ;;  %v5415_v46 = vld [vmem:[#allocation4 + $0x37c] ss:$20 sps:$4 sm:$0xff]  }
 0x113   :  { %v380_v47 = vpop.f32.mrf.mxu0  ;;  %v423_v48 = vpop.f32.mrf.mxu1 }
 0x114   :  { %v475_v51 = vmax.f32 %v423_v48, 0.0  ;;  %v473_v1 = vmax.f32 %v380_v47, 0.0  ;;  %v5410_v48 = vld [vmem:[#allocation4 + $0x238] ss:$20 sps:$4 sm:$0xff]  }
 0x115   :  { %v382_v49 = vpop.f32.mrf.mxu0  ;;  %v425_v50 = vpop.f32.mrf.mxu1 }
 0x116   :  { %v476_v54 = vmax.f32 %v425_v50, 0.0  ;;  %v474_v59 = vmax.f32 %v382_v49, 0.0  ;;  %v5413_v49 = vld [vmem:[#allocation4 + $0x378] ss:$20 sps:$4 sm:$0xff]   ;;  %v5418_v50 = vld [vmem:[#allocation4 + $0x214] ss:$20 sps:$4 sm:$0xff]  }
 0x117   :  { %v384_v52 = vpop.f32.mrf.mxu0  ;;  %v427_v53 = vpop.f32.mrf.mxu1 }
 0x118   :  { %v480_v55 = vmax.f32 %v427_v53, 0.0  ;;  %v478_v56 = vmax.f32 %v384_v52, 0.0  ;;  %v5416_v52 = vld [vmem:[#allocation4 + $0x210] ss:$20 sps:$4 sm:$0xff]  }
 0x119   :  { %v386_v57 = vpop.f32.mrf.mxu0  ;;  %v429_v58 = vpop.f32.mrf.mxu1  ;;  %v5419_v53 = vld [vmem:[#allocation4 + $0x350] ss:$20 sps:$4 sm:$0xff]  }
 0x11a   :  { %v479_v60 = vmax.f32 %v386_v57, 0.0  ;;  %v481_v61 = vmax.f32 %v429_v58, 0.0  ;;  %v6045_v2 = vpack.c.bf16 %v480_v55, %v475_v51  ;;  %v6051_v7 = vpack.c.bf16 %v478_v56, %v473_v1  ;;  %v5421_v51 = vld [vmem:[#allocation4 + $0x354] ss:$20 sps:$4 sm:$0xff]   ;;  %v5427_v55 = vld [vmem:[#allocation4 + $0x32c] ss:$20 sps:$4 sm:$0xff]  }
 0x11b   :  { %v5422_v56 = vld [vmem:[#allocation4 + $0x1e8] ss:$20 sps:$4 sm:$0xff]   ;;  %v5430_v58 = vld [vmem:[#allocation4 + $0x1c4] ss:$20 sps:$4 sm:$0xff]  }
 0x11c   :  { %v6047_v4 = vpack.c.bf16 %v479_v60, %v474_v59  ;;  %v6049_v5 = vpack.c.bf16 %v481_v61, %v476_v54  ;;  %v5424_v54 = vld [vmem:[#allocation4 + $0x1ec] ss:$20 sps:$4 sm:$0xff]   ;;  %v5425_v57 = vld [vmem:[#allocation4 + $0x328] ss:$20 sps:$4 sm:$0xff]   ;;  %v5433_v59 = vld [vmem:[#allocation4 + $0x304] ss:$20 sps:$4 sm:$0xff]  }
 0x11d   :  { %v5428_v60 = vld [vmem:[#allocation4 + $0x1c0] ss:$20 sps:$4 sm:$0xff]   ;;  %v5434_v1 = vld [vmem:[#allocation4 + $0x198] ss:$20 sps:$4 sm:$0xff]  }
 0x11e   :  { %1800 = vmatprep.mubr.bf16.mxu1 %v6047_v4  ;;  %1843 = vmatprep.mubr.bf16.mxu0 %v6049_v5  ;;  %v5431_v61 = vld [vmem:[#allocation4 + $0x300] ss:$20 sps:$4 sm:$0xff]  }
 0x11f   :  { %1801 = vmatmul.mubr.bf16.vlgmr.msra.gmra.mxu1 %v6051_v7  ;;  %1844 = vmatmul.mubr.bf16.vlgmr.msra.gmra.mxu0 %v6045_v2 }
 0x120   :  { %1855 = vmatpush1.bf16.msra.mxu1 %v5356_v62  ;;  %1898 = vmatpush1.bf16.msra.mxu0 %v5359_v63  ;;  %v5436_v62 = vld [vmem:[#allocation4 + $0x19c] ss:$20 sps:$4 sm:$0xff]  }
 0x121   :  { %1929 = vmatprep.mubr.bf16.mxu0 %v6047_v4  ;;  %1856 = vmatprep.subr.bf16.mxu1 %v5364_v3  ;;  %v5439_v63 = vld [vmem:[#allocation4 + $0x2dc] ss:$20 sps:$4 sm:$0xff]   ;;  %v5437_v3 = vld [vmem:[#allocation4 + $0x2d8] ss:$20 sps:$4 sm:$0xff]  }
 0x122   :  { %1899 = vmatprep.subr.bf16.mxu0 %v5367_v6  ;;  %1886 = vmatprep.mubr.bf16.mxu1 %v5970_v0  ;;  %v5442_v6 = vld [vmem:[#allocation4 + $0x174] ss:$20 sps:$4 sm:$0xff]  }
 0x124   :  { %1857 = vmatpush1.bf16.msra.mxu1 %v5362_v8  ;;  %1900 = vmatpush1.bf16.msra.mxu0 %v5365_v9  ;;  %v5445_v8 = vld [vmem:[#allocation4 + $0x2b4] ss:$20 sps:$4 sm:$0xff]   ;;  %v5440_v9 = vld [vmem:[#allocation4 + $0x170] ss:$20 sps:$4 sm:$0xff]  }
 0x125   :  { %1858 = vmatprep.subr.bf16.mxu1 %v5370_v10  ;;  %1901 = vmatprep.subr.bf16.mxu0 %v5373_v11  ;;  %v5443_v10 = vld [vmem:[#allocation4 + $0x2b0] ss:$20 sps:$4 sm:$0xff]   ;;  %v5448_v11 = vld [vmem:[#allocation4 + $0x14c] ss:$20 sps:$4 sm:$0xff]  }
 0x128   :  { %1859 = vmatpush1.bf16.msra.mxu1 %v5368_v12  ;;  %1902 = vmatpush1.bf16.msra.mxu0 %v5371_v13  ;;  %v5451_v12 = vld [vmem:[#allocation4 + $0x28c] ss:$20 sps:$4 sm:$0xff]   ;;  %v5446_v13 = vld [vmem:[#allocation4 + $0x148] ss:$20 sps:$4 sm:$0xff]  }
 0x129   :  { %1860 = vmatprep.subr.bf16.mxu1 %v5376_v14  ;;  %1903 = vmatprep.subr.bf16.mxu0 %v5379_v15  ;;  %v5449_v14 = vld [vmem:[#allocation4 + $0x288] ss:$20 sps:$4 sm:$0xff]   ;;  %v5454_v15 = vld [vmem:[#allocation4 + $0x4e4] ss:$20 sps:$4 sm:$0xff]  }
 0x12c   :  { %1861 = vmatpush1.bf16.msra.mxu1 %v5374_v16  ;;  %1904 = vmatpush1.bf16.msra.mxu0 %v5377_v17  ;;  %v5457_v16 = vld [vmem:[#allocation4 + $0x624] ss:$20 sps:$4 sm:$0xff]   ;;  %v5452_v17 = vld [vmem:[#allocation4 + $0x4e0] ss:$20 sps:$4 sm:$0xff]  }
 0x12d   :  { %1862 = vmatprep.subr.bf16.mxu1 %v5382_v18  ;;  %1905 = vmatprep.subr.bf16.mxu0 %v5385_v19  ;;  %v5455_v18 = vld [vmem:[#allocation4 + $0x620] ss:$20 sps:$4 sm:$0xff]   ;;  %v5460_v19 = vld [vmem:[#allocation4 + $0x4bc] ss:$20 sps:$4 sm:$0xff]  }
 0x130   :  { %1863 = vmatpush1.bf16.msra.mxu1 %v5380_v20  ;;  %1906 = vmatpush1.bf16.msra.mxu0 %v5383_v21  ;;  %v5463_v20 = vld [vmem:[#allocation4 + $0x5fc] ss:$20 sps:$4 sm:$0xff]   ;;  %v5458_v21 = vld [vmem:[#allocation4 + $0x4b8] ss:$20 sps:$4 sm:$0xff]  }
 0x131   :  { %1864 = vmatprep.subr.bf16.mxu1 %v5388_v22  ;;  %1907 = vmatprep.subr.bf16.mxu0 %v5391_v23  ;;  %v5461_v22 = vld [vmem:[#allocation4 + $0x5f8] ss:$20 sps:$4 sm:$0xff]   ;;  %v5466_v23 = vld [vmem:[#allocation4 + $0x494] ss:$20 sps:$4 sm:$0xff]  }
 0x133   :  { %v466_v30 = vpop.f32.mrf.mxu0 }
 0x134   :  { %1865 = vmatpush1.bf16.msra.mxu1 %v5386_v24  ;;  %1908 = vmatpush1.bf16.msra.mxu0 %v5389_v25  ;;  %v477_v40 = vmax.f32 %v466_v30, 0.0  ;;  %v5469_v24 = vld [vmem:[#allocation4 + $0x5d4] ss:$20 sps:$4 sm:$0xff]   ;;  %v5464_v25 = vld [vmem:[#allocation4 + $0x490] ss:$20 sps:$4 sm:$0xff]  }
 0x135   :  { %v5110_v32 = vpop.f32.mrf.mxu0  ;;  %1866 = vmatprep.subr.bf16.mxu1 %v5394_v26  ;;  %1909 = vmatprep.subr.bf16.mxu0 %v5397_v27  ;;  %v5467_v26 = vld [vmem:[#allocation4 + $0x5d0] ss:$20 sps:$4 sm:$0xff]   ;;  %v5472_v27 = vld [vmem:[#allocation4 + $0x46c] ss:$20 sps:$4 sm:$0xff]   ;;  %v5473_v30 = vld [vmem:[#allocation4 + $0x5a8] ss:$20 sps:$4 sm:$0xff]  }
 0x136   :  { %v5481_v32 = vld [vmem:[#allocation4 + $0x584] ss:$20 sps:$4 sm:$0xff]  }
 0x137   :  { %v469_v37 = vpop.f32.mrf.mxu0 }
 0x138   :  { %1867 = vmatpush1.bf16.msra.mxu1 %v5392_v28  ;;  %1910 = vmatpush1.bf16.msra.mxu0 %v5395_v29  ;;  %v482_v41 = vmax.f32 %v469_v37, 0.0  ;;  %v5475_v28 = vld [vmem:[#allocation4 + $0x5ac] ss:$20 sps:$4 sm:$0xff]   ;;  %v5470_v29 = vld [vmem:[#allocation4 + $0x468] ss:$20 sps:$4 sm:$0xff]  }
 0x139   :  { %v5111_v42 = vpop.f32.mrf.mxu0  ;;  %1868 = vmatprep.subr.bf16.mxu1 %v5400_v31  ;;  %1911 = vmatprep.subr.bf16.mxu0 %v5403_v33  ;;  %v5478_v31 = vld [vmem:[#allocation4 + $0x444] ss:$20 sps:$4 sm:$0xff]   ;;  %v5476_v33 = vld [vmem:[#allocation4 + $0x440] ss:$20 sps:$4 sm:$0xff]   ;;  %v5487_v37 = vld [vmem:[#allocation4 + $0x55c] ss:$20 sps:$4 sm:$0xff]  }
 0x13a   :  { %v6059_v47 = vpack.c.bf16 %v482_v41, %v477_v40  ;;  %v5490_v40 = vld [vmem:[#allocation4 + $0x3f4] ss:$20 sps:$4 sm:$0xff]   ;;  %v5488_v42 = vld [vmem:[#allocation4 + $0x3f0] ss:$20 sps:$4 sm:$0xff]  }
 0x13b   :  { %v5493_v41 = vld [vmem:[#allocation4 + $0x534] ss:$20 sps:$4 sm:$0xff]  }
 0x13c   :  { %1869 = vmatpush1.bf16.msra.mxu1 %v5398_v34  ;;  %1912 = vmatpush1.bf16.msra.mxu0 %v5401_v35  ;;  %v5479_v34 = vld [vmem:[#allocation4 + $0x580] ss:$20 sps:$4 sm:$0xff]   ;;  %v5484_v35 = vld [vmem:[#allocation4 + $0x41c] ss:$20 sps:$4 sm:$0xff]  }
 0x13d   :  { %1913 = vmatprep.subr.bf16.mxu0 %v5406_v38  ;;  %1940 = vmatprep.subr.bf16.mxu1 %v5409_v39  ;;  %v5482_v38 = vld [vmem:[#allocation4 + $0x418] ss:$20 sps:$4 sm:$0xff]  }
 0x13e   :  { %v5485_v39 = vld [vmem:[#allocation4 + $0x558] ss:$20 sps:$4 sm:$0xff]  }
 0x13f   :  { %1887 = vmatmul.mubr.bf16.vlgmr.msra.gmra.mxu1 %v6059_v47 }
 0x140   :  { %1914 = vmatpush2.bf16.msra.mxu0 %v5404_v43  ;;  %1941 = vmatpush1.bf16.msra.mxu1 %v5407_v44  ;;  %v5491_v43 = vld [vmem:[#allocation4 + $0x530] ss:$20 sps:$4 sm:$0xff]   ;;  %v5496_v44 = vld [vmem:[#allocation4 + $0x3cc] ss:$20 sps:$4 sm:$0xff]  }
 0x141   :  { %1972 = vmatprep.mubr.bf16.mxu1 %v6049_v5  ;;  %1915 = vmatprep.subr.bf16.mxu0 %v5412_v45  ;;  %v5499_v45 = vld [vmem:[#allocation4 + $0x50c] ss:$20 sps:$4 sm:$0xff]  }
 0x142   :  { %1942 = vmatprep.subr.bf16.mxu1 %v5415_v46  ;;  %v5494_v46 = vld [vmem:[#allocation4 + $0x3c8] ss:$20 sps:$4 sm:$0xff]  }
 0x144   :  { %1916 = vmatpush2.bf16.msra.mxu0 %v5410_v48  ;;  %1943 = vmatpush1.bf16.msra.mxu1 %v5413_v49  ;;  %v5497_v48 = vld [vmem:[#allocation4 + $0x508] ss:$20 sps:$4 sm:$0xff]  }
 0x145   :  { %1917 = vmatprep.subr.bf16.mxu0 %v5418_v50  ;;  %1944 = vmatprep.subr.bf16.mxu1 %v5421_v51  ;;  %v5500_v49 = vld [vmem:[#allocation4 + $0x268] ss:$20 sps:$4 sm:$0xff]  }
 0x146   :  { %v5501_v50 = vld [vmem:[#allocation4 + $0x4e8] ss:$20 sps:$4 sm:$0xff]  }
 0x147   :  { %v5502_v51 = vld [vmem:[#allocation4 + $0x128] ss:$20 sps:$4 sm:$0xff]  }
 0x148   :  { %1918 = vmatpush2.bf16.msra.mxu0 %v5416_v52  ;;  %1945 = vmatpush1.bf16.msra.mxu1 %v5419_v53  ;;  %v5503_v52 = vld [vmem:[#allocation4 + $0x3a8] ss:$20 sps:$4 sm:$0xff]   ;;  %v5504_v53 = vld [vmem:[#allocation4 + $0x240] ss:$20 sps:$4 sm:$0xff]  }
 0x149   :  { %1919 = vmatprep.subr.bf16.mxu0 %v5424_v54  ;;  %1946 = vmatprep.subr.bf16.mxu1 %v5427_v55  ;;  %v5505_v54 = vld [vmem:[#allocation4 + $0x4c0] ss:$20 sps:$4 sm:$0xff]  }
 0x14a   :  { %v5506_v55 = vld [vmem:[#allocation4 + $0x100] ss:$20 sps:$4 sm:$0xff]  }
 0x14c   :  { %1920 = vmatpush2.bf16.msra.mxu0 %v5422_v56  ;;  %1947 = vmatpush1.bf16.msra.mxu1 %v5425_v57  ;;  %v5507_v56 = vld [vmem:[#allocation4 + $0x380] ss:$20 sps:$4 sm:$0xff]   ;;  %v5508_v57 = vld [vmem:[#allocation4 + $0x218] ss:$20 sps:$4 sm:$0xff]  }
 0x14d   :  { %1921 = vmatprep.subr.bf16.mxu0 %v5430_v58  ;;  %1948 = vmatprep.subr.bf16.mxu1 %v5433_v59  ;;  %v5509_v58 = vld [vmem:[#allocation4 + $0x498] ss:$20 sps:$4 sm:$0xff]  }
 0x14e   :  { %v5510_v59 = vld [vmem:[#allocation4 + $0xd8] ss:$20 sps:$4 sm:$0xff]  }
 0x150   :  { %1922 = vmatpush2.bf16.msra.mxu0 %v5428_v60  ;;  %1949 = vmatpush1.bf16.msra.mxu1 %v5431_v61  ;;  %v5511_v60 = vld [vmem:[#allocation4 + $0x358] ss:$20 sps:$4 sm:$0xff]   ;;  %v5512_v61 = vld [vmem:[#allocation4 + $0x1f0] ss:$20 sps:$4 sm:$0xff]  }
 0x151   :  { %1923 = vmatprep.subr.bf16.mxu0 %v5436_v62  ;;  %1950 = vmatprep.subr.bf16.mxu1 %v5439_v63  ;;  %v5513_v62 = vld [vmem:[#allocation4 + $0x470] ss:$20 sps:$4 sm:$0xff]  }
 0x152   :  { %v5514_v63 = vld [vmem:[#allocation4 + $0xb0] ss:$20 sps:$4 sm:$0xff]  }
 0x154   :  { %1924 = vmatpush2.bf16.msra.mxu0 %v5434_v1  ;;  %1951 = vmatpush1.bf16.msra.mxu1 %v5437_v3  ;;  %v5516_v1 = vld [vmem:[#allocation4 + $0x1c8] ss:$20 sps:$4 sm:$0xff]  }
 0x155   :  { %1925 = vmatprep.subr.bf16.mxu0 %v5442_v6  ;;  %1952 = vmatprep.subr.bf16.mxu1 %v5445_v8  ;;  %v5518_v3 = vld [vmem:[#allocation4 + $0x88] ss:$20 sps:$4 sm:$0xff]   ;;  %v5520_v8 = vld [vmem:[#allocation4 + $0x1a0] ss:$20 sps:$4 sm:$0xff]  }
 0x156   :  { %v5519_v6 = vld [vmem:[#allocation4 + $0x308] ss:$20 sps:$4 sm:$0xff]  }
 0x158   :  { %1926 = vmatpush2.bf16.msra.mxu0 %v5440_v9  ;;  %1953 = vmatpush1.bf16.msra.mxu1 %v5443_v10  ;;  %v5521_v9 = vld [vmem:[#allocation4 + $0x420] ss:$20 sps:$4 sm:$0xff]  }
 0x159   :  { %1927 = vmatprep.subr.bf16.mxu0 %v5448_v11  ;;  %1954 = vmatprep.subr.bf16.mxu1 %v5451_v12  ;;  %v5522_v10 = vld [vmem:[#allocation4 + $0x60] ss:$20 sps:$4 sm:$0xff]   ;;  %v5524_v12 = vld [vmem:[#allocation4 + $0x178] ss:$20 sps:$4 sm:$0xff]  }
 0x15a   :  { %v5523_v11 = vld [vmem:[#allocation4 + $0x2e0] ss:$20 sps:$4 sm:$0xff]  }
 0x15c   :  { %1928 = vmatpush2.bf16.msra.mxu0 %v5446_v13  ;;  %1955 = vmatpush1.bf16.msra.mxu1 %v5449_v14  ;;  %v5525_v13 = vld [vmem:[#allocation4 + $0x3f8] ss:$20 sps:$4 sm:$0xff]  }
 0x15d   :  { %1956 = vmatprep.subr.bf16.mxu1 %v5454_v15  ;;  %1983 = vmatprep.subr.bf16.mxu0 %v5457_v16  ;;  %v5526_v14 = vld [vmem:[#allocation4 + $0x38] ss:$20 sps:$4 sm:$0xff]   ;;  %v5528_v16 = vld [vmem:[#allocation4 + $0x150] ss:$20 sps:$4 sm:$0xff]  }
 0x15e   :  { %v5527_v15 = vld [vmem:[#allocation4 + $0x2b8] ss:$20 sps:$4 sm:$0xff]  }
 0x15f   :  { %1930 = vmatmul.mubr.bf16.vlgmr.msra.gmra.mxu0 %v6051_v7 }
 0x160   :  { %1957 = vmatpush2.bf16.msra.mxu1 %v5452_v17  ;;  %1984 = vmatpush1.bf16.msra.mxu0 %v5455_v18  ;;  %v5529_v17 = vld [vmem:[#allocation4 + $0x3d0] ss:$20 sps:$4 sm:$0xff]  }
 0x161   :  { %1958 = vmatprep.subr.bf16.mxu1 %v5460_v19  ;;  %1985 = vmatprep.subr.bf16.mxu0 %v5463_v20  ;;  %v5530_v18 = vld [vmem:[#allocation4 + $0x10] ss:$20 sps:$4 sm:$0xff]  }
 0x162   :  { %2015 = vmatprep.mubr.bf16.mxu0 %v5970_v0  ;;  %v5531_v19 = vld [vmem:[#allocation4 + $0x290] ss:$20 sps:$4 sm:$0xff]  }
 0x163   :  { %v5542_v20 = vld [vmem:[#allocation6 + $0x11c] ss:$20 sps:$4 sm:$0xff]  }
 0x164   :  { %1959 = vmatpush2.bf16.msra.mxu1 %v5458_v21  ;;  %1986 = vmatpush1.bf16.msra.mxu0 %v5461_v22  ;;  %v5532_v21 = vld [vmem:[#allocation4 + $0x628] ss:$20 sps:$4 sm:$0xff]   ;;  %v5540_v22 = vld [vmem:[#allocation6 + $0x118] ss:$20 sps:$4 sm:$0xff]  }
 0x165   :  { %1960 = vmatprep.subr.bf16.mxu1 %v5466_v23  ;;  %1987 = vmatprep.subr.bf16.mxu0 %v5469_v24  ;;  %v5545_v23 = vld [vmem:[#allocation6 + $0xf4] ss:$20 sps:$4 sm:$0xff]  }
 0x166   :  { %v5533_v24 = vld [vmem:[#allocation4 + $0x600] ss:$20 sps:$4 sm:$0xff]  }
 0x168   :  { %1961 = vmatpush2.bf16.msra.mxu1 %v5464_v25  ;;  %1988 = vmatpush1.bf16.msra.mxu0 %v5467_v26  ;;  %v5543_v25 = vld [vmem:[#allocation6 + $0xf0] ss:$20 sps:$4 sm:$0xff]   ;;  %v5548_v26 = vld [vmem:[#allocation6 + $0xcc] ss:$20 sps:$4 sm:$0xff]  }
 0x169   :  { %1962 = vmatprep.subr.bf16.mxu1 %v5472_v27  ;;  %1989 = vmatprep.subr.bf16.mxu0 %v5475_v28  ;;  %v5534_v27 = vld [vmem:[#allocation4 + $0x5d8] ss:$20 sps:$4 sm:$0xff]  }
 0x16a   :  { %v5551_v28 = vld [vmem:[#allocation6 + $0xa4] ss:$20 sps:$4 sm:$0xff]  }
 0x16c   :  { %1963 = vmatpush2.bf16.msra.mxu1 %v5470_v29  ;;  %1990 = vmatpush1.bf16.msra.mxu0 %v5473_v30  ;;  %v5549_v29 = vld [vmem:[#allocation6 + $0xa0] ss:$20 sps:$4 sm:$0xff]   ;;  %v5554_v30 = vld [vmem:[#allocation6 + $0x7c] ss:$20 sps:$4 sm:$0xff]  }
 0x16d   :  { %1964 = vmatprep.subr.bf16.mxu1 %v5478_v31  ;;  %1991 = vmatprep.subr.bf16.mxu0 %v5481_v32  ;;  %v5536_v31 = vld [vmem:[#allocation4 + $0x588] ss:$20 sps:$4 sm:$0xff]   ;;  %v5552_v32 = vld [vmem:[#allocation6 + $0x78] ss:$20 sps:$4 sm:$0xff]  }
 0x170   :  { %1965 = vmatpush2.bf16.msra.mxu1 %v5476_v33  ;;  %1992 = vmatpush1.bf16.msra.mxu0 %v5479_v34  ;;  %v5557_v33 = vld [vmem:[#allocation6 + $0x54] ss:$20 sps:$4 sm:$0xff]  }
 0x171   :  { %1966 = vmatprep.subr.bf16.mxu1 %v5484_v35  ;;  %1993 = vmatprep.subr.bf16.mxu0 %v5487_v37  ;;  %v5537_v34 = vld [vmem:[#allocation4 + $0x560] ss:$20 sps:$4 sm:$0xff]   ;;  %v5555_v35 = vld [vmem:[#allocation6 + $0x50] ss:$20 sps:$4 sm:$0xff]  }
 0x172   :  { %v5560_v37 = vld [vmem:[#allocation6 + $0x2c] ss:$20 sps:$4 sm:$0xff]  }
 0x174   :  { %1967 = vmatpush2.bf16.msra.mxu1 %v5482_v38  ;;  %1994 = vmatpush1.bf16.msra.mxu0 %v5485_v39  ;;  %v5538_v38 = vld [vmem:[#allocation4 + $0x538] ss:$20 sps:$4 sm:$0xff]   ;;  %v5558_v39 = vld [vmem:[#allocation6 + $0x28] ss:$20 sps:$4 sm:$0xff]  }
 0x175   :  { %1968 = vmatprep.subr.bf16.mxu1 %v5490_v40  ;;  %1995 = vmatprep.subr.bf16.mxu0 %v5493_v41  ;;  %v5563_v40 = vld [vmem:[#allocation6 + $0x4] ss:$20 sps:$4 sm:$0xff]  }
 0x176   :  { %v5539_v41 = vld [vmem:[#allocation4 + $0x510] ss:$20 sps:$4 sm:$0xff]  }
 0x178   :  { %1969 = vmatpush2.bf16.msra.mxu1 %v5488_v42  ;;  %1996 = vmatpush1.bf16.msra.mxu0 %v5491_v43  ;;  %v5590_v42 = vld [vmem:[#allocation6 + $0x39c] ss:$20 sps:$4 sm:$0xff]   ;;  %v5561_v43 = vld [vmem:[#allocation6] ss:$20 sps:$4 sm:$0xff]  }
 0x179   :  { %1970 = vmatprep.subr.bf16.mxu1 %v5496_v44  ;;  %1997 = vmatprep.subr.bf16.mxu0 %v5499_v45  ;;  %v5566_v44 = vld [vmem:[#allocation6 + $0x25c] ss:$20 sps:$4 sm:$0xff]   ;;  %v5588_v45 = vld [vmem:[#allocation6 + $0x398] ss:$20 sps:$4 sm:$0xff]  }
 0x17c   :  { %1971 = vmatpush2.bf16.msra.mxu1 %v5494_v46  ;;  %1998 = vmatpush1.bf16.msra.mxu0 %v5497_v48  ;;  %v5593_v46 = vld [vmem:[#allocation6 + $0x374] ss:$20 sps:$4 sm:$0xff]   ;;  %v5564_v48 = vld [vmem:[#allocation6 + $0x258] ss:$20 sps:$4 sm:$0xff]  }
 0x17d   :  { %4924 = vmatprep.subr.bf16.mxu1 %v5500_v49  ;;  %4946 = vmatprep.subr.bf16.mxu0 %v5501_v50  ;;  %v5569_v49 = vld [vmem:[#allocation6 + $0x234] ss:$20 sps:$4 sm:$0xff]   ;;  %v5591_v50 = vld [vmem:[#allocation6 + $0x370] ss:$20 sps:$4 sm:$0xff]  }
 0x17f   :  { %1973 = vmatmul.mubr.bf16.vlgmr.msra.gmra.mxu1 %v6045_v2  ;;  %2016 = vmatmul.mubr.bf16.vlgmr.msra.gmra.mxu0 %v6059_v47 }
 0x180   :  { %4925 = vmatpush3.bf16.msra.mxu1 %v5502_v51  ;;  %2058 = vmatprep.mubr.bf16.mxu1 %v6047_v4  ;;  %v5515_v4 = vld [vmem:[#allocation4 + $0x330] ss:$20 sps:$4 sm:$0xff]   ;;  %v5596_v51 = vld [vmem:[#allocation6 + $0x34c] ss:$20 sps:$4 sm:$0xff]  }
 0x181   :  { %4947 = vmatpush3.bf16.msra.mxu0 %v5503_v52  ;;  %2099 = vmatprep.mubr.bf16.mxu0 %v6049_v5  ;;  %v5517_v5 = vld [vmem:[#allocation4 + $0x448] ss:$20 sps:$4 sm:$0xff]   ;;  %v5567_v52 = vld [vmem:[#allocation6 + $0x230] ss:$20 sps:$4 sm:$0xff]  }
 0x182   :  { %4926 = vmatprep.subr.bf16.mxu1 %v5504_v53  ;;  %4948 = vmatprep.subr.bf16.mxu0 %v5505_v54  ;;  %v5572_v53 = vld [vmem:[#allocation6 + $0x20c] ss:$20 sps:$4 sm:$0xff]   ;;  %v5594_v54 = vld [vmem:[#allocation6 + $0x348] ss:$20 sps:$4 sm:$0xff]  }
 0x184   :  { %4927 = vmatpush3.bf16.msra.mxu1 %v5506_v55  ;;  %v5599_v55 = vld [vmem:[#allocation6 + $0x324] ss:$20 sps:$4 sm:$0xff]  }
 0x185   :  { %4949 = vmatpush3.bf16.msra.mxu0 %v5507_v56  ;;  %4928 = vmatprep.subr.bf16.mxu1 %v5508_v57  ;;  %v5570_v56 = vld [vmem:[#allocation6 + $0x208] ss:$20 sps:$4 sm:$0xff]   ;;  %v5575_v57 = vld [vmem:[#allocation6 + $0x1e4] ss:$20 sps:$4 sm:$0xff]  }
 0x186   :  { %4950 = vmatprep.subr.bf16.mxu0 %v5509_v58  ;;  %v5602_v58 = vld [vmem:[#allocation6 + $0x2fc] ss:$20 sps:$4 sm:$0xff]  }
 0x188   :  { %4929 = vmatpush3.bf16.msra.mxu1 %v5510_v59  ;;  %v5573_v59 = vld [vmem:[#allocation6 + $0x1e0] ss:$20 sps:$4 sm:$0xff]  }
 0x189   :  { %4951 = vmatpush3.bf16.msra.mxu0 %v5511_v60  ;;  %4930 = vmatprep.subr.bf16.mxu1 %v5512_v61  ;;  %v5578_v60 = vld [vmem:[#allocation6 + $0x1bc] ss:$20 sps:$4 sm:$0xff]   ;;  %v5600_v61 = vld [vmem:[#allocation6 + $0x2f8] ss:$20 sps:$4 sm:$0xff]  }
 0x18a   :  { %4952 = vmatprep.subr.bf16.mxu0 %v5513_v62  ;;  %v5605_v62 = vld [vmem:[#allocation6 + $0x2d4] ss:$20 sps:$4 sm:$0xff]  }
 0x18c   :  { %4931 = vmatpush3.bf16.msra.mxu1 %v5514_v63  ;;  %v5576_v63 = vld [vmem:[#allocation6 + $0x1b8] ss:$20 sps:$4 sm:$0xff]  }
 0x18d   :  { %4953 = vmatpush3.bf16.msra.mxu0 %v5515_v4  ;;  %4932 = vmatprep.subr.bf16.mxu1 %v5516_v1  ;;  %v5581_v4 = vld [vmem:[#allocation6 + $0x194] ss:$20 sps:$4 sm:$0xff]   ;;  %v5603_v1 = vld [vmem:[#allocation6 + $0x2d0] ss:$20 sps:$4 sm:$0xff]  }
 0x18e   :  { %4954 = vmatprep.subr.bf16.mxu0 %v5517_v5  ;;  %v5608_v5 = vld [vmem:[#allocation6 + $0x2ac] ss:$20 sps:$4 sm:$0xff]  }
 0x190   :  { %4933 = vmatpush3.bf16.msra.mxu1 %v5518_v3  ;;  %v5579_v3 = vld [vmem:[#allocation6 + $0x190] ss:$20 sps:$4 sm:$0xff]  }
 0x191   :  { %4955 = vmatpush3.bf16.msra.mxu0 %v5519_v6  ;;  %4934 = vmatprep.subr.bf16.mxu1 %v5520_v8  ;;  %v5584_v6 = vld [vmem:[#allocation6 + $0x16c] ss:$20 sps:$4 sm:$0xff]   ;;  %v5606_v8 = vld [vmem:[#allocation6 + $0x2a8] ss:$20 sps:$4 sm:$0xff]  }
 0x192   :  { %4956 = vmatprep.subr.bf16.mxu0 %v5521_v9  ;;  %v5611_v9 = vld [vmem:[#allocation6 + $0x284] ss:$20 sps:$4 sm:$0xff]  }
 0x194   :  { %4935 = vmatpush3.bf16.msra.mxu1 %v5522_v10  ;;  %v5582_v10 = vld [vmem:[#allocation6 + $0x168] ss:$20 sps:$4 sm:$0xff]  }
 0x195   :  { %4957 = vmatpush3.bf16.msra.mxu0 %v5523_v11  ;;  %4936 = vmatprep.subr.bf16.mxu1 %v5524_v12  ;;  %v5587_v11 = vld [vmem:[#allocation6 + $0x144] ss:$20 sps:$4 sm:$0xff]   ;;  %v5609_v12 = vld [vmem:[#allocation6 + $0x280] ss:$20 sps:$4 sm:$0xff]  }
 0x196   :  { %4958 = vmatprep.subr.bf16.mxu0 %v5525_v13  ;;  %v5614_v13 = vld [vmem:[#allocation6 + $0x4dc] ss:$20 sps:$4 sm:$0xff]  }
 0x198   :  { %4937 = vmatpush3.bf16.msra.mxu1 %v5526_v14  ;;  %v5585_v14 = vld [vmem:[#allocation6 + $0x140] ss:$20 sps:$4 sm:$0xff]  }
 0x199   :  { %4959 = vmatpush3.bf16.msra.mxu0 %v5527_v15  ;;  %4938 = vmatprep.subr.bf16.mxu1 %v5528_v16  ;;  %v5612_v15 = vld [vmem:[#allocation6 + $0x4d8] ss:$20 sps:$4 sm:$0xff]   ;;  %v5617_v16 = vld [vmem:[#allocation6 + $0x4b4] ss:$20 sps:$4 sm:$0xff]  }
 0x19a   :  { %4960 = vmatprep.subr.bf16.mxu0 %v5529_v17  ;;  %v5615_v17 = vld [vmem:[#allocation6 + $0x4b0] ss:$20 sps:$4 sm:$0xff]  }
 0x19c   :  { %4939 = vmatpush3.bf16.msra.mxu1 %v5530_v18  ;;  %v5620_v18 = vld [vmem:[#allocation6 + $0x48c] ss:$20 sps:$4 sm:$0xff]  }
 0x19d   :  { %4961 = vmatpush3.bf16.msra.mxu0 %v5531_v19  ;;  %5112 = vmatprep.subr.bf16.mxu1 %v5971_v36  ;;  %v5618_v19 = vld [vmem:[#allocation6 + $0x488] ss:$20 sps:$4 sm:$0xff]  }
 0x19e   :  { %3444 = vmatprep.subr.bf16.mxu0 %v5542_v20  ;;  %v5623_v20 = vld [vmem:[#allocation6 + $0x464] ss:$20 sps:$4 sm:$0xff]  }
 0x19f   :  { %2059 = vmatmul.mubr.bf16.vlgmr.msra.gmra.mxu1 %v6051_v7  ;;  %v5546_v7 = vld [vmem:[#allocation6 + $0xc8] ss:$20 sps:$4 sm:$0xff]  }
 0x1a0   :  { %2100 = vmatmul.mubr.bf16.vlgmr.msra.gmra.mxu0 %v6045_v2  ;;  %5113 = vmatpush3.bf16.msra.mxu1 %v5532_v21  ;;  %v5535_v2 = vld [vmem:[#allocation4 + $0x5b0] ss:$20 sps:$4 sm:$0xff]   ;;  %v5621_v21 = vld [vmem:[#allocation6 + $0x460] ss:$20 sps:$4 sm:$0xff]  }
 0x1a1   :  { %5114 = vmatprep.subr.bf16.mxu1 %v5971_v36  ;;  %5128 = vmatprep.mubr.msk.bf16.mxu1 %vm5972_vm0, %v5971_v36 }
 0x1a2   :  { %3445 = vmatpush1.bf16.msra.mxu0 %v5540_v22  ;;  %v5659_v22 = vld [vmem:[#allocation6 + $0x61c] ss:$20 sps:$4 sm:$0xff]  }
 0x1a3   :  { %3446 = vmatprep.subr.bf16.mxu0 %v5545_v23  ;;  %v5626_v23 = vld [vmem:[#allocation6 + $0x43c] ss:$20 sps:$4 sm:$0xff]  }
 0x1a4   :  { %5115 = vmatpush3.bf16.msra.mxu1 %v5533_v24  ;;  %v5624_v24 = vld [vmem:[#allocation6 + $0x438] ss:$20 sps:$4 sm:$0xff]  }
 0x1a5   :  { %5116 = vmatprep.subr.bf16.mxu1 %v5971_v36 }
 0x1a6   :  { %3447 = vmatpush1.bf16.msra.mxu0 %v5543_v25  ;;  %v5629_v25 = vld [vmem:[#allocation6 + $0x414] ss:$20 sps:$4 sm:$0xff]  }
 0x1a7   :  { %3448 = vmatprep.subr.bf16.mxu0 %v5548_v26  ;;  %v5627_v26 = vld [vmem:[#allocation6 + $0x410] ss:$20 sps:$4 sm:$0xff]  }
 0x1a8   :  { %5117 = vmatpush3.bf16.msra.mxu1 %v5534_v27 }
 0x1a9   :  { %5118 = vmatprep.subr.bf16.mxu1 %v5971_v36 }
 0x1aa   :  { %3449 = vmatpush1.bf16.msra.mxu0 %v5546_v7  ;;  %v5632_v7 = vld [vmem:[#allocation6 + $0x3ec] ss:$20 sps:$4 sm:$0xff]  }
 0x1ab   :  { %3450 = vmatprep.subr.bf16.mxu0 %v5551_v28  ;;  %v5630_v28 = vld [vmem:[#allocation6 + $0x3e8] ss:$20 sps:$4 sm:$0xff]  }
 0x1ac   :  { %5119 = vmatpush3.bf16.msra.mxu1 %v5535_v2 }
 0x1ad   :  { %5120 = vmatprep.subr.bf16.mxu1 %v5971_v36 }
 0x1ae   :  { %3451 = vmatpush1.bf16.msra.mxu0 %v5549_v29 }
 0x1af   :  { %3452 = vmatprep.subr.bf16.mxu0 %v5554_v30  ;;  %v5635_v30 = vld [vmem:[#allocation6 + $0x3c4] ss:$20 sps:$4 sm:$0xff]  }
 0x1b0   :  { %5121 = vmatpush3.bf16.msra.mxu1 %v5536_v31  ;;  %v5633_v31 = vld [vmem:[#allocation6 + $0x3c0] ss:$20 sps:$4 sm:$0xff]  }
 0x1b1   :  { %5122 = vmatprep.subr.bf16.mxu1 %v5971_v36 }
 0x1b2   :  { %3453 = vmatpush1.bf16.msra.mxu0 %v5552_v32 }
 0x1b3   :  { %3454 = vmatprep.subr.bf16.mxu0 %v5557_v33 }
 0x1b4   :  { %5123 = vmatpush3.bf16.msra.mxu1 %v5537_v34  ;;  %v5638_v34 = vld [vmem:[#allocation6 + $0x124] ss:$20 sps:$4 sm:$0xff]  }
 0x1b5   :  { %5124 = vmatprep.subr.bf16.mxu1 %v5971_v36 }
 0x1b6   :  { %3455 = vmatpush1.bf16.msra.mxu0 %v5555_v35 }
 0x1b7   :  { %3456 = vmatprep.subr.bf16.mxu0 %v5560_v37 }
 0x1b8   :  { %5125 = vmatpush3.bf16.msra.mxu1 %v5538_v38 }
 0x1b9   :  { %5126 = vmatprep.subr.bf16.mxu1 %v5971_v36 }
 0x1ba   :  { %3457 = vmatpush1.bf16.msra.mxu0 %v5558_v39 }
 0x1bb   :  { %3458 = vmatprep.subr.bf16.mxu0 %v5563_v40 }
 0x1bc   :  { %5127 = vmatpush3.bf16.msra.mxu1 %v5539_v41 }
 0x1bd   :  { %3487 = vmatprep.subr.bf16.mxu1 %v5590_v42 }
 0x1be   :  { %3459 = vmatpush1.bf16.msra.mxu0 %v5561_v43 }
 0x1bf   :  { %5129 = vmatmul.mubr.bf16.vlgmr.msra.gmra.mxu1 %v6059_v47  ;;  %3460 = vmatprep.subr.bf16.mxu0 %v5566_v44  ;;  %v5597_v47 = vld [vmem:[#allocation6 + $0x320] ss:$20 sps:$4 sm:$0xff]  }
 0x1c0   :  { %3488 = vmatpush1.bf16.msra.mxu1 %v5588_v45 }
 0x1c1   :  { %3489 = vmatprep.subr.bf16.mxu1 %v5593_v46 }
 0x1c2   :  { %3461 = vmatpush2.bf16.msra.mxu0 %v5564_v48 }
 0x1c3   :  { %3462 = vmatprep.subr.bf16.mxu0 %v5569_v49 }
 0x1c4   :  { %3490 = vmatpush1.bf16.msra.mxu1 %v5591_v50 }
 0x1c5   :  { %3491 = vmatprep.subr.bf16.mxu1 %v5596_v51 }
 0x1c6   :  { %3463 = vmatpush2.bf16.msra.mxu0 %v5567_v52 }
 0x1c7   :  { %3464 = vmatprep.subr.bf16.mxu0 %v5572_v53 }
 0x1c8   :  { %3492 = vmatpush1.bf16.msra.mxu1 %v5594_v54 }
 0x1c9   :  { %3493 = vmatprep.subr.bf16.mxu1 %v5599_v55 }
 0x1ca   :  { %3465 = vmatpush2.bf16.msra.mxu0 %v5570_v56 }
 0x1cb   :  { %3466 = vmatprep.subr.bf16.mxu0 %v5575_v57  ;;  %v5657_v57 = vld [vmem:[#allocation6 + $0x618] ss:$20 sps:$4 sm:$0xff]  }
 0x1cc   :  { %3494 = vmatpush1.bf16.msra.mxu1 %v5597_v47 }
 0x1cd   :  { %3495 = vmatprep.subr.bf16.mxu1 %v5602_v58  ;;  %v5665_v58 = vld [vmem:[#allocation6 + $0x5f4] ss:$20 sps:$4 sm:$0xff]  }
 0x1ce   :  { %3467 = vmatpush2.bf16.msra.mxu0 %v5573_v59  ;;  %v5663_v59 = vld [vmem:[#allocation6 + $0x5f0] ss:$20 sps:$4 sm:$0xff]  }
 0x1cf   :  { %3468 = vmatprep.subr.bf16.mxu0 %v5578_v60  ;;  %v5671_v60 = vld [vmem:[#allocation6 + $0x5cc] ss:$20 sps:$4 sm:$0xff]  }
 0x1d0   :  { %3496 = vmatpush1.bf16.msra.mxu1 %v5600_v61  ;;  %v5669_v61 = vld [vmem:[#allocation6 + $0x5c8] ss:$20 sps:$4 sm:$0xff]  }
 0x1d1   :  { %3497 = vmatprep.subr.bf16.mxu1 %v5605_v62  ;;  %v5677_v62 = vld [vmem:[#allocation6 + $0x5a4] ss:$20 sps:$4 sm:$0xff]  }
 0x1d2   :  { %3469 = vmatpush2.bf16.msra.mxu0 %v5576_v63  ;;  %v5675_v63 = vld [vmem:[#allocation6 + $0x5a0] ss:$20 sps:$4 sm:$0xff]  }
 0x1d3   :  { %3470 = vmatprep.subr.bf16.mxu0 %v5581_v4  ;;  %v5683_v4 = vld [vmem:[#allocation6 + $0x57c] ss:$20 sps:$4 sm:$0xff]  }
 0x1d4   :  { %3498 = vmatpush1.bf16.msra.mxu1 %v5603_v1  ;;  %v5681_v1 = vld [vmem:[#allocation6 + $0x578] ss:$20 sps:$4 sm:$0xff]  }
 0x1d5   :  { %3499 = vmatprep.subr.bf16.mxu1 %v5608_v5  ;;  %v5689_v5 = vld [vmem:[#allocation6 + $0x554] ss:$20 sps:$4 sm:$0xff]  }
 0x1d6   :  { %3471 = vmatpush2.bf16.msra.mxu0 %v5579_v3  ;;  %v5687_v3 = vld [vmem:[#allocation6 + $0x550] ss:$20 sps:$4 sm:$0xff]  }
 0x1d7   :  { %3472 = vmatprep.subr.bf16.mxu0 %v5584_v6  ;;  %v5695_v6 = vld [vmem:[#allocation6 + $0x52c] ss:$20 sps:$4 sm:$0xff]  }
 0x1d8   :  { %3500 = vmatpush1.bf16.msra.mxu1 %v5606_v8  ;;  %v5693_v8 = vld [vmem:[#allocation6 + $0x528] ss:$20 sps:$4 sm:$0xff]  }
 0x1d9   :  { %3501 = vmatprep.subr.bf16.mxu1 %v5611_v9  ;;  %v5701_v9 = vld [vmem:[#allocation6 + $0x504] ss:$20 sps:$4 sm:$0xff]  }
 0x1da   :  { %3473 = vmatpush2.bf16.msra.mxu0 %v5582_v10  ;;  %v5699_v10 = vld [vmem:[#allocation6 + $0x500] ss:$20 sps:$4 sm:$0xff]  }
 0x1db   :  { %3474 = vmatprep.subr.bf16.mxu0 %v5587_v11  ;;  %v5707_v11 = vld [vmem:[#allocation6 + $0x3a4] ss:$20 sps:$4 sm:$0xff]  }
 0x1dc   :  { %3502 = vmatpush1.bf16.msra.mxu1 %v5609_v12 }
 0x1dd   :  { %3503 = vmatprep.subr.bf16.mxu1 %v5614_v13 }
 0x1de   :  { %3475 = vmatpush2.bf16.msra.mxu0 %v5585_v14 }
 0x1df   :  { %3530 = vmatprep.subr.bf16.mxu0 %v5659_v22  ;;  %v1802_v27 = vpop.f32.mrf.mxu1  ;;  %v1845_v2 = vpop.f32.mrf.mxu0 }
 0x1e0   :  { %3504 = vmatpush2.bf16.msra.mxu1 %v5612_v15  ;;  %v1846_v43 = vadd.f32 %v1845_v2, %v1802_v27 }
 0x1e1   :  { %3505 = vmatprep.subr.bf16.mxu1 %v5617_v16  ;;  %v1804_v29 = vpop.f32.mrf.mxu1  ;;  %v1847_v32 = vpop.f32.mrf.mxu0 }
 0x1e2   :  { %v1848_v41 = vadd.f32 %v1847_v32, %v1804_v29 }
 0x1e3   :  { %v1806_v33 = vpop.f32.mrf.mxu1  ;;  %v1849_v35 = vpop.f32.mrf.mxu0 }
 0x1e4   :  { %3506 = vmatpush2.bf16.msra.mxu1 %v5615_v17  ;;  %v1850_v42 = vadd.f32 %v1849_v35, %v1806_v33  ;;  %v5636_v35 = vld [vmem:[#allocation6 + $0x120] ss:$20 sps:$4 sm:$0xff]  }
 0x1e5   :  { %3507 = vmatprep.subr.bf16.mxu1 %v5620_v18  ;;  %v1808_v37 = vpop.f32.mrf.mxu1  ;;  %v1851_v39 = vpop.f32.mrf.mxu0 }
 0x1e6   :  { %v1852_v45 = vadd.f32 %v1851_v39, %v1808_v37  ;;  %v5639_v39 = vld [vmem:[#allocation6 + $0xf8] ss:$20 sps:$4 sm:$0xff]  }
 0x1e8   :  { %3508 = vmatpush2.bf16.msra.mxu1 %v5618_v19 }
 0x1e9   :  { %3509 = vmatprep.subr.bf16.mxu1 %v5623_v20 }
 0x1ec   :  { %3510 = vmatpush2.bf16.msra.mxu1 %v5621_v21 }
 0x1ed   :  { %3511 = vmatprep.subr.bf16.mxu1 %v5626_v23 }
 0x1f0   :  { %3512 = vmatpush2.bf16.msra.mxu1 %v5624_v24 }
 0x1f1   :  { %3513 = vmatprep.subr.bf16.mxu1 %v5629_v25 }
 0x1f4   :  { %3514 = vmatpush2.bf16.msra.mxu1 %v5627_v26 }
 0x1f5   :  { %3515 = vmatprep.subr.bf16.mxu1 %v5632_v7 }
 0x1f8   :  { %3516 = vmatpush2.bf16.msra.mxu1 %v5630_v28 }
 0x1f9   :  { %3517 = vmatprep.subr.bf16.mxu1 %v5635_v30 }
 0x1fc   :  { %3518 = vmatpush2.bf16.msra.mxu1 %v5633_v31 }
 0x1fd   :  { %3573 = vmatprep.subr.bf16.mxu1 %v5638_v34 }
 0x1ff   :  { %v1888_v38 = vpop.f32.mrf.mxu1 }
 0x200   :  { %v1889_v49 = vadd.f32 %v1888_v38, %v1846_v43  ;;  %v5641_v38 = vld [vmem:[#allocation6 + $0xfc] ss:$20 sps:$4 sm:$0xff]  }
 0x201   :  { %v1890_v40 = vpop.f32.mrf.mxu1  ;;  %v5645_v43 = vld [vmem:[#allocation6 + $0xa8] ss:$20 sps:$4 sm:$0xff]  }
 0x202   :  { %v1891_v46 = vadd.f32 %v1890_v40, %v1848_v41  ;;  %v2149_v55 = vmax.f32 %v1889_v49, 0.0  ;;  %v5644_v40 = vld [vmem:[#allocation6 + $0xd4] ss:$20 sps:$4 sm:$0xff]   ;;  %v5642_v41 = vld [vmem:[#allocation6 + $0xd0] ss:$20 sps:$4 sm:$0xff]  }
 0x203   :  { %v1892_v44 = vpop.f32.mrf.mxu1  ;;  %v5656_v49 = vld [vmem:[#allocation6 + $0x34] ss:$20 sps:$4 sm:$0xff]  }
 0x204   :  { %v1893_v48 = vadd.f32 %v1892_v44, %v1850_v42  ;;  %v2150_v53 = vmax.f32 %v1891_v46, 0.0  ;;  %v5647_v42 = vld [vmem:[#allocation6 + $0xac] ss:$20 sps:$4 sm:$0xff]   ;;  %v5650_v44 = vld [vmem:[#allocation6 + $0x84] ss:$20 sps:$4 sm:$0xff]  }
 0x205   :  { %v1894_v50 = vpop.f32.mrf.mxu1  ;;  %v5653_v46 = vld [vmem:[#allocation6 + $0x5c] ss:$20 sps:$4 sm:$0xff]  }
 0x206   :  { %v1895_v51 = vadd.f32 %v1894_v50, %v1852_v45  ;;  %v2154_v52 = vmax.f32 %v1893_v48, 0.0  ;;  %v5648_v45 = vld [vmem:[#allocation6 + $0x80] ss:$20 sps:$4 sm:$0xff]   ;;  %v5651_v48 = vld [vmem:[#allocation6 + $0x58] ss:$20 sps:$4 sm:$0xff]  }
 0x207   :  { %v5654_v50 = vld [vmem:[#allocation6 + $0x30] ss:$20 sps:$4 sm:$0xff]  }
 0x208   :  { %v2155_v54 = vmax.f32 %v1895_v51, 0.0  ;;  %v6084_v47 = vpack.c.bf16 %v2154_v52, %v2149_v55  ;;  %v5662_v51 = vld [vmem:[#allocation6 + $0xc] ss:$20 sps:$4 sm:$0xff]   ;;  %v5660_v52 = vld [vmem:[#allocation6 + $0x8] ss:$20 sps:$4 sm:$0xff]  }
 0x209   :  { %v5674_v55 = vld [vmem:[#allocation6 + $0x23c] ss:$20 sps:$4 sm:$0xff]  }
 0x20a   :  { %v6082_v56 = vpack.c.bf16 %v2155_v54, %v2150_v53  ;;  %v5668_v53 = vld [vmem:[#allocation6 + $0x264] ss:$20 sps:$4 sm:$0xff]   ;;  %v5666_v54 = vld [vmem:[#allocation6 + $0x260] ss:$20 sps:$4 sm:$0xff]  }
 0x20c   :  { %3476 = vmatprep.mubr.bf16.mxu0 %v6082_v56 }
 0x20d   :  { %3477 = vmatmul.mubr.bf16.vlgmr.msra.gmra.mxu0 %v6084_v47 }
 0x20e   :  { %3531 = vmatpush1.bf16.msra.mxu0 %v5657_v57  ;;  %3562 = vmatprep.mubr.bf16.mxu0 %v5970_v0 }
 0x20f   :  { %3532 = vmatprep.subr.bf16.mxu0 %v5665_v58 }
 0x212   :  { %3533 = vmatpush1.bf16.msra.mxu0 %v5663_v59  ;;  %v5672_v59 = vld [vmem:[#allocation6 + $0x238] ss:$20 sps:$4 sm:$0xff]  }
 0x213   :  { %3534 = vmatprep.subr.bf16.mxu0 %v5671_v60  ;;  %v5680_v60 = vld [vmem:[#allocation6 + $0x214] ss:$20 sps:$4 sm:$0xff]  }
 0x216   :  { %3535 = vmatpush1.bf16.msra.mxu0 %v5669_v61 }
 0x217   :  { %3536 = vmatprep.subr.bf16.mxu0 %v5677_v62 }
 0x21a   :  { %3537 = vmatpush1.bf16.msra.mxu0 %v5675_v63  ;;  %v5678_v63 = vld [vmem:[#allocation6 + $0x210] ss:$20 sps:$4 sm:$0xff]  }
 0x21b   :  { %3538 = vmatprep.subr.bf16.mxu0 %v5683_v4  ;;  %v5686_v4 = vld [vmem:[#allocation6 + $0x1ec] ss:$20 sps:$4 sm:$0xff]  }
 0x21e   :  { %3539 = vmatpush1.bf16.msra.mxu0 %v5681_v1 }
 0x21f   :  { %3540 = vmatprep.subr.bf16.mxu0 %v5689_v5  ;;  %v1931_v12 = vpop.f32.mrf.mxu0 }
 0x221   :  { %v1933_v13 = vpop.f32.mrf.mxu0 }
 0x222   :  { %3541 = vmatpush1.bf16.msra.mxu0 %v5687_v3  ;;  %v5684_v3 = vld [vmem:[#allocation6 + $0x1e8] ss:$20 sps:$4 sm:$0xff]  }
 0x223   :  { %3542 = vmatprep.subr.bf16.mxu0 %v5695_v6  ;;  %v1935_v14 = vpop.f32.mrf.mxu0  ;;  %v5692_v6 = vld [vmem:[#allocation6 + $0x1c4] ss:$20 sps:$4 sm:$0xff]  }
 0x225   :  { %v1937_v15 = vpop.f32.mrf.mxu0 }
 0x226   :  { %3543 = vmatpush1.bf16.msra.mxu0 %v5693_v8 }
 0x227   :  { %3544 = vmatprep.subr.bf16.mxu0 %v5701_v9 }
 0x22a   :  { %3545 = vmatpush1.bf16.msra.mxu0 %v5699_v10 }
 0x22b   :  { %3616 = vmatprep.subr.bf16.mxu0 %v5707_v11 }
 0x23f   :  { %v1974_v16 = vpop.f32.mrf.mxu1  ;;  %v2017_v17 = vpop.f32.mrf.mxu0 }
 0x240   :  { %v1975_v21 = vadd.f32 %v1974_v16, %v1931_v12  ;;  %v5690_v12 = vld [vmem:[#allocation6 + $0x1c0] ss:$20 sps:$4 sm:$0xff]  }
 0x241   :  { %v1976_v18 = vpop.f32.mrf.mxu1  ;;  %v2019_v19 = vpop.f32.mrf.mxu0 }
 0x242   :  { %v1977_v20 = vadd.f32 %v1976_v18, %v1933_v13  ;;  %v2018_v28 = vadd.f32 %v2017_v17, %v1975_v21  ;;  %v5698_v13 = vld [vmem:[#allocation6 + $0x19c] ss:$20 sps:$4 sm:$0xff]   ;;  %v5696_v18 = vld [vmem:[#allocation6 + $0x198] ss:$20 sps:$4 sm:$0xff]  }
 0x243   :  { %v1978_v22 = vpop.f32.mrf.mxu1  ;;  %v2021_v23 = vpop.f32.mrf.mxu0 }
 0x244   :  { %v1979_v24 = vadd.f32 %v1978_v22, %v1935_v14  ;;  %v2020_v26 = vadd.f32 %v2019_v19, %v1977_v20  ;;  %v2151_v33 = vmax.f32 %v2018_v28, 0.0  ;;  %v5704_v20 = vld [vmem:[#allocation6 + $0x174] ss:$20 sps:$4 sm:$0xff]  }
 0x245   :  { %v1980_v25 = vpop.f32.mrf.mxu1  ;;  %v2023_v2 = vpop.f32.mrf.mxu0 }
 0x246   :  { %v2022_v27 = vadd.f32 %v2021_v23, %v1979_v24  ;;  %v1981_v7 = vadd.f32 %v1980_v25, %v1937_v15  ;;  %v2152_v31 = vmax.f32 %v2020_v26, 0.0  ;;  %v5702_v25 = vld [vmem:[#allocation6 + $0x170] ss:$20 sps:$4 sm:$0xff]  }
 0x248   :  { %v2024_v29 = vadd.f32 %v2023_v2, %v1981_v7  ;;  %v2156_v30 = vmax.f32 %v2022_v27, 0.0  ;;  %v5710_v27 = vld [vmem:[#allocation6 + $0x14c] ss:$20 sps:$4 sm:$0xff]  }
 0x249   :  { %v5705_v2 = vld [vmem:[#allocation6 + $0x3a0] ss:$20 sps:$4 sm:$0xff]  }
 0x24a   :  { %v2157_v32 = vmax.f32 %v2024_v29, 0.0  ;;  %v6091_v37 = vpack.c.bf16 %v2156_v30, %v2151_v33  ;;  %v5708_v30 = vld [vmem:[#allocation6 + $0x148] ss:$20 sps:$4 sm:$0xff]   ;;  %v5711_v33 = vld [vmem:[#allocation6 + $0x378] ss:$20 sps:$4 sm:$0xff]  }
 0x24c   :  { %v6089_v34 = vpack.c.bf16 %v2157_v32, %v2152_v31  ;;  %v5713_v31 = vld [vmem:[#allocation6 + $0x37c] ss:$20 sps:$4 sm:$0xff]   ;;  %v5716_v32 = vld [vmem:[#allocation6 + $0x624] ss:$20 sps:$4 sm:$0xff]  }
 0x24e   :  { %3519 = vmatprep.mubr.bf16.mxu1 %v6089_v34 }
 0x24f   :  { %3520 = vmatmul.mubr.bf16.vlgmr.msra.gmra.mxu1 %v6091_v37 }
 0x250   :  { %3574 = vmatpush1.bf16.msra.mxu1 %v5636_v35  ;;  %3605 = vmatprep.mubr.bf16.mxu1 %v6082_v56  ;;  %v5714_v35 = vld [vmem:[#allocation6 + $0x620] ss:$20 sps:$4 sm:$0xff]  }
 0x251   :  { %3575 = vmatprep.subr.bf16.mxu1 %v5641_v38  ;;  %v5719_v38 = vld [vmem:[#allocation6 + $0x354] ss:$20 sps:$4 sm:$0xff]  }
 0x254   :  { %3576 = vmatpush1.bf16.msra.mxu1 %v5639_v39  ;;  %v5722_v39 = vld [vmem:[#allocation6 + $0x5fc] ss:$20 sps:$4 sm:$0xff]  }
 0x255   :  { %3577 = vmatprep.subr.bf16.mxu1 %v5644_v40  ;;  %v5717_v40 = vld [vmem:[#allocation6 + $0x350] ss:$20 sps:$4 sm:$0xff]  }
 0x258   :  { %3578 = vmatpush1.bf16.msra.mxu1 %v5642_v41  ;;  %v5720_v41 = vld [vmem:[#allocation6 + $0x5f8] ss:$20 sps:$4 sm:$0xff]  }
 0x259   :  { %3579 = vmatprep.subr.bf16.mxu1 %v5647_v42  ;;  %v5725_v42 = vld [vmem:[#allocation6 + $0x32c] ss:$20 sps:$4 sm:$0xff]  }
 0x25c   :  { %3580 = vmatpush1.bf16.msra.mxu1 %v5645_v43  ;;  %v5728_v43 = vld [vmem:[#allocation6 + $0x5d4] ss:$20 sps:$4 sm:$0xff]  }
 0x25d   :  { %3581 = vmatprep.subr.bf16.mxu1 %v5650_v44  ;;  %v5723_v44 = vld [vmem:[#allocation6 + $0x328] ss:$20 sps:$4 sm:$0xff]  }
 0x25f   :  { %v4940_v57 = vpop.f32.mrf.mxu1 }
 0x260   :  { %3582 = vmatpush1.bf16.msra.mxu1 %v5648_v45  ;;  %v4962_v58 = vpop.f32.mrf.mxu0  ;;  %v5726_v45 = vld [vmem:[#allocation6 + $0x5d0] ss:$20 sps:$4 sm:$0xff]  }
 0x261   :  { %3583 = vmatprep.subr.bf16.mxu1 %v5653_v46  ;;  %v4941_v61 = vpop.f32.mrf.mxu1  ;;  %v5731_v46 = vld [vmem:[#allocation6 + $0x304] ss:$20 sps:$4 sm:$0xff]  }
 0x262   :  { %v4963_v62 = vpop.f32.mrf.mxu0  ;;  %v4942_v10 = vadd.f32 %v4941_v61, %v4940_v57  ;;  %v5741_v57 = vld [vmem:[#allocation6 + $0x2b0] ss:$20 sps:$4 sm:$0xff]   ;;  %v5747_v61 = vld [vmem:[#allocation6 + $0x288] ss:$20 sps:$4 sm:$0xff]  }
 0x263   :  { %v4943_v1 = vpop.f32.mrf.mxu1  ;;  %v4964_v11 = vadd.f32 %v4963_v62, %v4962_v58  ;;  %v5744_v58 = vld [vmem:[#allocation6 + $0x558] ss:$20 sps:$4 sm:$0xff]   ;;  %v5750_v62 = vld [vmem:[#allocation6 + $0x530] ss:$20 sps:$4 sm:$0xff]  }
 0x264   :  { %3584 = vmatpush1.bf16.msra.mxu1 %v5651_v48  ;;  %v4965_v5 = vpop.f32.mrf.mxu0  ;;  %v5734_v48 = vld [vmem:[#allocation6 + $0x5ac] ss:$20 sps:$4 sm:$0xff]  }
 0x265   :  { %3585 = vmatprep.subr.bf16.mxu1 %v5656_v49  ;;  %v4944_v8 = vpop.f32.mrf.mxu1  ;;  %v2102_v17 = vadd.f32 %v4964_v11, %v4942_v10  ;;  %v5729_v49 = vld [vmem:[#allocation6 + $0x300] ss:$20 sps:$4 sm:$0xff]  }
 0x266   :  { %v4966_v9 = vpop.f32.mrf.mxu0  ;;  %v4945_v14 = vadd.f32 %v4944_v8, %v4943_v1  ;;  %v5753_v1 = vld [vmem:[#allocation6 + $0x4e0] ss:$20 sps:$4 sm:$0xff]   ;;  %v5759_v8 = vld [vmem:[#allocation6 + $0x4b8] ss:$20 sps:$4 sm:$0xff]  }
 0x267   :  { %v4967_v15 = vadd.f32 %v4966_v9, %v4965_v5  ;;  %v5756_v5 = vld [vmem:[#allocation6 + $0x508] ss:$20 sps:$4 sm:$0xff]   ;;  %v5767_v11 = vld [vmem:[#allocation6 + $0x4c0] ss:$20 sps:$4 sm:$0xff]  }
 0x268   :  { %3586 = vmatpush1.bf16.msra.mxu1 %v5654_v50  ;;  %v5732_v50 = vld [vmem:[#allocation6 + $0x5a8] ss:$20 sps:$4 sm:$0xff]  }
 0x269   :  { %3587 = vmatprep.subr.bf16.mxu1 %v5662_v51  ;;  %v2105_v22 = vadd.f32 %v4967_v15, %v4945_v14  ;;  %v5737_v51 = vld [vmem:[#allocation6 + $0x2dc] ss:$20 sps:$4 sm:$0xff]   ;;  %v5766_v10 = vld [vmem:[#allocation6 + $0x494] ss:$20 sps:$4 sm:$0xff]   ;;  %v5771_v14 = vld [vmem:[#allocation6 + $0x46c] ss:$20 sps:$4 sm:$0xff]  }
 0x26a   :  { %v5763_v9 = vld [vmem:[#allocation6 + $0x3a8] ss:$20 sps:$4 sm:$0xff]   ;;  %v5772_v15 = vld [vmem:[#allocation6 + $0x498] ss:$20 sps:$4 sm:$0xff]  }
 0x26c   :  { %3588 = vmatpush1.bf16.msra.mxu1 %v5660_v52  ;;  %v5740_v52 = vld [vmem:[#allocation6 + $0x584] ss:$20 sps:$4 sm:$0xff]  }
 0x26d   :  { %3589 = vmatprep.subr.bf16.mxu1 %v5668_v53  ;;  %v5735_v53 = vld [vmem:[#allocation6 + $0x2d8] ss:$20 sps:$4 sm:$0xff]  }
 0x270   :  { %3590 = vmatpush2.bf16.msra.mxu1 %v5666_v54  ;;  %v5743_v54 = vld [vmem:[#allocation6 + $0x2b4] ss:$20 sps:$4 sm:$0xff]  }
 0x271   :  { %3591 = vmatprep.subr.bf16.mxu1 %v5674_v55  ;;  %v5746_v55 = vld [vmem:[#allocation6 + $0x55c] ss:$20 sps:$4 sm:$0xff]  }
 0x274   :  { %3592 = vmatpush2.bf16.msra.mxu1 %v5672_v59  ;;  %v5749_v59 = vld [vmem:[#allocation6 + $0x28c] ss:$20 sps:$4 sm:$0xff]  }
 0x275   :  { %3593 = vmatprep.subr.bf16.mxu1 %v5680_v60  ;;  %v5752_v60 = vld [vmem:[#allocation6 + $0x534] ss:$20 sps:$4 sm:$0xff]  }
 0x278   :  { %3594 = vmatpush2.bf16.msra.mxu1 %v5678_v63  ;;  %v5755_v63 = vld [vmem:[#allocation6 + $0x4e4] ss:$20 sps:$4 sm:$0xff]  }
 0x279   :  { %3595 = vmatprep.subr.bf16.mxu1 %v5686_v4  ;;  %v5758_v4 = vld [vmem:[#allocation6 + $0x50c] ss:$20 sps:$4 sm:$0xff]  }
 0x27c   :  { %3596 = vmatpush2.bf16.msra.mxu1 %v5684_v3  ;;  %v5761_v3 = vld [vmem:[#allocation6 + $0x4bc] ss:$20 sps:$4 sm:$0xff]  }
 0x27d   :  { %3597 = vmatprep.subr.bf16.mxu1 %v5692_v6  ;;  %v5762_v6 = vld [vmem:[#allocation6 + $0x4e8] ss:$20 sps:$4 sm:$0xff]  }
 0x27f   :  { %v2142_v16 = vpop.f32.mrf.mxu1 }
 0x280   :  { %3598 = vmatpush2.bf16.msra.mxu1 %v5690_v12  ;;  %v2143_v21 = vadd.f32 %v2142_v16, %v2102_v17  ;;  %v5764_v12 = vld [vmem:[#allocation6 + $0x490] ss:$20 sps:$4 sm:$0xff]   ;;  %v5769_v16 = vld [vmem:[#allocation6 + $0x468] ss:$20 sps:$4 sm:$0xff]   ;;  %v5773_v17 = vld [vmem:[#allocation6 + $0x358] ss:$20 sps:$4 sm:$0xff]  }
 0x281   :  { %v5130_v19 = vpop.f32.mrf.mxu1  ;;  %3599 = vmatprep.subr.bf16.mxu1 %v5698_v13  ;;  %v5768_v13 = vld [vmem:[#allocation6 + $0x380] ss:$20 sps:$4 sm:$0xff]  }
 0x282   :  { %v2153_v7 = vmax.f32 %v2143_v21, 0.0  ;;  %v5777_v19 = vld [vmem:[#allocation6 + $0x470] ss:$20 sps:$4 sm:$0xff]  }
 0x283   :  { %v2145_v23 = vpop.f32.mrf.mxu1  ;;  %v5778_v21 = vld [vmem:[#allocation6 + $0x330] ss:$20 sps:$4 sm:$0xff]  }
 0x284   :  { %v2146_v24 = vadd.f32 %v2145_v23, %v2105_v22  ;;  %3600 = vmatpush2.bf16.msra.mxu1 %v5696_v18  ;;  %v5776_v18 = vld [vmem:[#allocation6 + $0x444] ss:$20 sps:$4 sm:$0xff]   ;;  %v5781_v22 = vld [vmem:[#allocation6 + $0x41c] ss:$20 sps:$4 sm:$0xff]  }
 0x285   :  { %v5131_v26 = vpop.f32.mrf.mxu1  ;;  %3601 = vmatprep.subr.bf16.mxu1 %v5704_v20  ;;  %v5774_v20 = vld [vmem:[#allocation6 + $0x440] ss:$20 sps:$4 sm:$0xff]   ;;  %v5779_v23 = vld [vmem:[#allocation6 + $0x418] ss:$20 sps:$4 sm:$0xff]  }
 0x286   :  { %v2158_v28 = vmax.f32 %v2146_v24, 0.0  ;;  %v5783_v24 = vld [vmem:[#allocation6 + $0x308] ss:$20 sps:$4 sm:$0xff]   ;;  %v5787_v26 = vld [vmem:[#allocation6 + $0x420] ss:$20 sps:$4 sm:$0xff]  }
 0x288   :  { %v6096_v29 = vpack.c.bf16 %v2158_v28, %v2153_v7  ;;  %3602 = vmatpush2.bf16.msra.mxu1 %v5702_v25  ;;  %v5786_v25 = vld [vmem:[#allocation6 + $0x3f4] ss:$20 sps:$4 sm:$0xff]   ;;  %v5791_v28 = vld [vmem:[#allocation6 + $0x3cc] ss:$20 sps:$4 sm:$0xff]  }
 0x289   :  { %3603 = vmatprep.subr.bf16.mxu1 %v5710_v27  ;;  %v5784_v27 = vld [vmem:[#allocation6 + $0x3f0] ss:$20 sps:$4 sm:$0xff]   ;;  %v5788_v7 = vld [vmem:[#allocation6 + $0x2e0] ss:$20 sps:$4 sm:$0xff]  }
 0x28a   :  { %3563 = vmatmul.mubr.bf16.vlgmr.msra.gmra.mxu0 %v6096_v29 }
 0x28b   :  { %3617 = vmatpush1.bf16.msra.mxu0 %v5705_v2  ;;  %3648 = vmatprep.mubr.bf16.mxu0 %v6089_v34  ;;  %v5792_v2 = vld [vmem:[#allocation6 + $0x3f8] ss:$20 sps:$4 sm:$0xff]  }
 0x28c   :  { %3604 = vmatpush2.bf16.msra.mxu1 %v5708_v30  ;;  %3618 = vmatprep.subr.bf16.mxu0 %v5713_v31  ;;  %v5789_v30 = vld [vmem:[#allocation6 + $0x3c8] ss:$20 sps:$4 sm:$0xff]   ;;  %v5793_v31 = vld [vmem:[#allocation6 + $0x2b8] ss:$20 sps:$4 sm:$0xff]  }
 0x28d   :  { %3659 = vmatprep.subr.bf16.mxu1 %v5716_v32  ;;  %v5794_v32 = vld [vmem:[#allocation6 + $0x268] ss:$20 sps:$4 sm:$0xff]  }
 0x28f   :  { %3606 = vmatmul.mubr.bf16.vlgmr.msra.gmra.mxu1 %v6084_v47  ;;  %3619 = vmatpush1.bf16.msra.mxu0 %v5711_v33  ;;  %v5796_v33 = vld [vmem:[#allocation6 + $0x3d0] ss:$20 sps:$4 sm:$0xff]  }
 0x290   :  { %3660 = vmatpush1.bf16.msra.mxu1 %v5714_v35  ;;  %3620 = vmatprep.subr.bf16.mxu0 %v5719_v38  ;;  %v5795_v35 = vld [vmem:[#allocation6 + $0x128] ss:$20 sps:$4 sm:$0xff]   ;;  %v5797_v38 = vld [vmem:[#allocation6 + $0x290] ss:$20 sps:$4 sm:$0xff]  }
 0x291   :  { %3661 = vmatprep.subr.bf16.mxu1 %v5722_v39  ;;  %3691 = vmatprep.mubr.bf16.mxu1 %v5970_v0  ;;  %v5738_v0 = vld [vmem:[#allocation6 + $0x580] ss:$20 sps:$4 sm:$0xff]  }
 0x292   :  { %v5798_v39 = vld [vmem:[#allocation6 + $0x240] ss:$20 sps:$4 sm:$0xff]  }
 0x293   :  { %3621 = vmatpush1.bf16.msra.mxu0 %v5717_v40  ;;  %v5820_v40 = vld [vmem:[#allocation7 + $0x78] sm:$0xff]  }
 0x294   :  { %3662 = vmatpush1.bf16.msra.mxu1 %v5720_v41  ;;  %3622 = vmatprep.subr.bf16.mxu0 %v5725_v42  ;;  %v5799_v41 = vld [vmem:[#allocation6 + $0x100] ss:$20 sps:$4 sm:$0xff]   ;;  %v5800_v42 = vld [vmem:[#allocation6 + $0x218] ss:$20 sps:$4 sm:$0xff]  }
 0x295   :  { %3663 = vmatprep.subr.bf16.mxu1 %v5728_v43  ;;  %v5821_v43 = vld [vmem:[#allocation7 + $0x38] sm:$0xff]  }
 0x297   :  { %3623 = vmatpush1.bf16.msra.mxu0 %v5723_v44  ;;  %v5822_v44 = vld [vmem:[#allocation7 + $0x70] sm:$0xff]  }
 0x298   :  { %3664 = vmatpush1.bf16.msra.mxu1 %v5726_v45  ;;  %3624 = vmatprep.subr.bf16.mxu0 %v5731_v46  ;;  %v5801_v45 = vld [vmem:[#allocation6 + $0xd8] ss:$20 sps:$4 sm:$0xff]   ;;  %v5802_v46 = vld [vmem:[#allocation6 + $0x1f0] ss:$20 sps:$4 sm:$0xff]  }
 0x299   :  { %3665 = vmatprep.subr.bf16.mxu1 %v5734_v48  ;;  %v5823_v48 = vld [vmem:[#allocation7 + $0x30] sm:$0xff]  }
 0x29b   :  { %3625 = vmatpush1.bf16.msra.mxu0 %v5729_v49  ;;  %v5824_v49 = vld [vmem:[#allocation7 + $0x68] sm:$0xff]  }
 0x29c   :  { %3666 = vmatpush1.bf16.msra.mxu1 %v5732_v50  ;;  %3626 = vmatprep.subr.bf16.mxu0 %v5737_v51  ;;  %v5803_v50 = vld [vmem:[#allocation6 + $0xb0] ss:$20 sps:$4 sm:$0xff]   ;;  %v5825_v51 = vld [vmem:[#allocation7 + $0x28] sm:$0xff]  }
 0x29d   :  { %3667 = vmatprep.subr.bf16.mxu1 %v5740_v52  ;;  %v5826_v52 = vld [vmem:[#allocation7 + $0x60] sm:$0xff]  }
 0x29f   :  { %3627 = vmatpush1.bf16.msra.mxu0 %v5735_v53  ;;  %v5805_v53 = vld [vmem:[#allocation6 + $0x88] ss:$20 sps:$4 sm:$0xff]  }
 0x2a0   :  { %3668 = vmatpush1.bf16.msra.mxu1 %v5738_v0  ;;  %3628 = vmatprep.subr.bf16.mxu0 %v5743_v54  ;;  %v5806_v0 = vld [vmem:[#allocation6 + $0x1a0] ss:$20 sps:$4 sm:$0xff]   ;;  %v5828_v54 = vld [vmem:[#allocation7 + $0x58] sm:$0xff]  }
 0x2a1   :  { %3669 = vmatprep.subr.bf16.mxu1 %v5746_v55  ;;  %v5807_v55 = vld [vmem:[#allocation6 + $0x60] ss:$20 sps:$4 sm:$0xff]  }
 0x2a3   :  { %3629 = vmatpush1.bf16.msra.mxu0 %v5741_v57  ;;  %v5808_v57 = vld [vmem:[#allocation6 + $0x178] ss:$20 sps:$4 sm:$0xff]  }
 0x2a4   :  { %3670 = vmatpush1.bf16.msra.mxu1 %v5744_v58  ;;  %3630 = vmatprep.subr.bf16.mxu0 %v5749_v59  ;;  %v5829_v58 = vld [vmem:[#allocation7 + $0x18] sm:$0xff]   ;;  %v5830_v59 = vld [vmem:[#allocation7 + $0x50] sm:$0xff]  }
 0x2a5   :  { %3671 = vmatprep.subr.bf16.mxu1 %v5752_v60  ;;  %v5809_v60 = vld [vmem:[#allocation6 + $0x38] ss:$20 sps:$4 sm:$0xff]  }
 0x2a7   :  { %3631 = vmatpush1.bf16.msra.mxu0 %v5747_v61  ;;  %v5810_v61 = vld [vmem:[#allocation6 + $0x150] ss:$20 sps:$4 sm:$0xff]  }
 0x2a8   :  { %3672 = vmatpush1.bf16.msra.mxu1 %v5750_v62  ;;  %3632 = vmatprep.subr.bf16.mxu0 %v5755_v63  ;;  %v5831_v62 = vld [vmem:[#allocation7 + $0x10] sm:$0xff]   ;;  %v5832_v63 = vld [vmem:[#allocation7 + $0x48] sm:$0xff]  }
 0x2a9   :  { %3673 = vmatprep.subr.bf16.mxu1 %v5758_v4  ;;  %v5811_v4 = vld [vmem:[#allocation6 + $0x10] ss:$20 sps:$4 sm:$0xff]  }
 0x2ab   :  { %3633 = vmatpush2.bf16.msra.mxu0 %v5753_v1  ;;  %v5833_v1 = vld [vmem:[#allocation7 + $0x8] sm:$0xff]  }
 0x2ac   :  { %3674 = vmatpush1.bf16.msra.mxu1 %v5756_v5  ;;  %3634 = vmatprep.subr.bf16.mxu0 %v5761_v3  ;;  %v5834_v5 = vld [vmem:[#allocation7 + $0x40] sm:$0xff]   ;;  %v5812_v3 = vld [vmem:[#allocation6 + $0x628] ss:$20 sps:$4 sm:$0xff]  }
 0x2ad   :  { %4999 = vmatprep.subr.bf16.mxu1 %v5762_v6  ;;  %v5835_v6 = vld [vmem:[#allocation7] sm:$0xff]  }
 0x2af   :  { %3635 = vmatpush2.bf16.msra.mxu0 %v5759_v8  ;;  %3692 = vmatmul.mubr.bf16.vlgmr.msra.gmra.mxu1 %v6096_v29  ;;  %v5813_v8 = vld [vmem:[#allocation6 + $0x600] ss:$20 sps:$4 sm:$0xff]  }
 0x2b0   :  { %5000 = vmatpush3.bf16.msra.mxu1 %v5763_v9  ;;  %3775 = vmatprep.mubr.bf16.mxu1 %v6089_v34  ;;  %v5782_v34 = vld [vmem:[#allocation6 + $0x448] ss:$20 sps:$4 sm:$0xff]   ;;  %v5814_v9 = vld [vmem:[#allocation6 + $0x5d8] ss:$20 sps:$4 sm:$0xff]  }
 0x2b1   :  { %3636 = vmatprep.subr.bf16.mxu0 %v5766_v10  ;;  %5001 = vmatprep.subr.bf16.mxu1 %v5767_v11  ;;  %v5815_v10 = vld [vmem:[#allocation6 + $0x5b0] ss:$20 sps:$4 sm:$0xff]   ;;  %v5817_v11 = vld [vmem:[#allocation6 + $0x560] ss:$20 sps:$4 sm:$0xff]  }
 0x2b3   :  { %3637 = vmatpush2.bf16.msra.mxu0 %v5764_v12  ;;  %v5818_v12 = vld [vmem:[#allocation6 + $0x538] ss:$20 sps:$4 sm:$0xff]  }
 0x2b4   :  { %5002 = vmatpush3.bf16.msra.mxu1 %v5768_v13  ;;  %3638 = vmatprep.subr.bf16.mxu0 %v5771_v14  ;;  %v5819_v13 = vld [vmem:[#allocation6 + $0x510] ss:$20 sps:$4 sm:$0xff]   ;;  %v5836_v14 = vld [vmem:[#allocation7 + $0xf8] sm:$0xff]  }
 0x2b5   :  { %5003 = vmatprep.subr.bf16.mxu1 %v5772_v15  ;;  %v5837_v15 = vld [vmem:[#allocation7 + $0xb8] sm:$0xff]  }
 0x2b7   :  { %3639 = vmatpush2.bf16.msra.mxu0 %v5769_v16  ;;  %v5838_v16 = vld [vmem:[#allocation7 + $0xf0] sm:$0xff]  }
 0x2b8   :  { %5004 = vmatpush3.bf16.msra.mxu1 %v5773_v17  ;;  %3640 = vmatprep.subr.bf16.mxu0 %v5776_v18  ;;  %v5839_v17 = vld [vmem:[#allocation7 + $0xb0] sm:$0xff]   ;;  %v5840_v18 = vld [vmem:[#allocation7 + $0xe8] sm:$0xff]  }
 0x2b9   :  { %5005 = vmatprep.subr.bf16.mxu1 %v5777_v19  ;;  %v5841_v19 = vld [vmem:[#allocation7 + $0xa8] sm:$0xff]  }
 0x2bb   :  { %3641 = vmatpush2.bf16.msra.mxu0 %v5774_v20  ;;  %v5842_v20 = vld [vmem:[#allocation7 + $0xe0] sm:$0xff]  }
 0x2bc   :  { %5006 = vmatpush3.bf16.msra.mxu1 %v5778_v21  ;;  %3642 = vmatprep.subr.bf16.mxu0 %v5781_v22  ;;  %v5843_v21 = vld [vmem:[#allocation7 + $0xa0] sm:$0xff]   ;;  %v5844_v22 = vld [vmem:[#allocation7 + $0xd8] sm:$0xff]  }
 0x2bd   :  { %5007 = vmatprep.subr.bf16.mxu1 %v5782_v34  ;;  %v5845_v34 = vld [vmem:[#allocation7 + $0x98] sm:$0xff]  }
 0x2bf   :  { %3643 = vmatpush2.bf16.msra.mxu0 %v5779_v23  ;;  %v5846_v23 = vld [vmem:[#allocation7 + $0xd0] sm:$0xff]  }
 0x2c0   :  { %5008 = vmatpush3.bf16.msra.mxu1 %v5783_v24  ;;  %3644 = vmatprep.subr.bf16.mxu0 %v5786_v25  ;;  %v5847_v24 = vld [vmem:[#allocation7 + $0x90] sm:$0xff]   ;;  %v5849_v25 = vld [vmem:[#allocation7 + $0x88] sm:$0xff]  }
 0x2c1   :  { %5009 = vmatprep.subr.bf16.mxu1 %v5787_v26  ;;  %v5850_v26 = vld [vmem:[#allocation7 + $0xc0] sm:$0xff]  }
 0x2c3   :  { %3645 = vmatpush2.bf16.msra.mxu0 %v5784_v27  ;;  %v5851_v27 = vld [vmem:[#allocation7 + $0x80] sm:$0xff]  }
 0x2c4   :  { %5010 = vmatpush3.bf16.msra.mxu1 %v5788_v7  ;;  %3646 = vmatprep.subr.bf16.mxu0 %v5791_v28 }
 0x2c5   :  { %5011 = vmatprep.subr.bf16.mxu1 %v5792_v2 }
 0x2c7   :  { %3647 = vmatpush2.bf16.msra.mxu0 %v5789_v30 }
 0x2c8   :  { %5012 = vmatpush3.bf16.msra.mxu1 %v5793_v31  ;;  %4977 = vmatprep.subr.bf16.mxu0 %v5794_v32 }
 0x2c9   :  { %5013 = vmatprep.subr.bf16.mxu1 %v5796_v33 }
 0x2ca   :  { %3649 = vmatmul.mubr.bf16.vlgmr.msra.gmra.mxu0 %v6091_v37 }
 0x2cb   :  { %4978 = vmatpush3.bf16.msra.mxu0 %v5795_v35  ;;  %3734 = vmatprep.mubr.bf16.mxu0 %v6082_v56  ;;  %v5804_v56 = vld [vmem:[#allocation6 + $0x1c8] ss:$20 sps:$4 sm:$0xff]  }
 0x2cc   :  { %5014 = vmatpush3.bf16.msra.mxu1 %v5797_v38  ;;  %4979 = vmatprep.subr.bf16.mxu0 %v5798_v39 }
 0x2cd   :  { %5030 = vmatprep.subr.bf16.mxu1 %v5820_v40  ;;  %v3478_v7 = vpop.f32.mrf.mxu0 }
 0x2cf   :  { %4980 = vmatpush3.bf16.msra.mxu0 %v5799_v41  ;;  %3776 = vmatmul.mubr.bf16.vlgmr.msra.gmra.mxu1 %v6091_v37  ;;  %v5827_v37 = vld [vmem:[#allocation7 + $0x20] sm:$0xff]   ;;  %v3480_v28 = vpop.f32.mrf.mxu0 }
 0x2d0   :  { %4981 = vmatprep.subr.bf16.mxu0 %v5800_v42  ;;  %5031 = vmatpush3.bf16.msra.mxu1 %v5821_v43 }
 0x2d1   :  { %5032 = vmatprep.subr.bf16.mxu1 %v5822_v44  ;;  %v3482_v30 = vpop.f32.mrf.mxu0 }
 0x2d3   :  { %4982 = vmatpush3.bf16.msra.mxu0 %v5801_v45  ;;  %v3484_v32 = vpop.f32.mrf.mxu0 }
 0x2d4   :  { %4983 = vmatprep.subr.bf16.mxu0 %v5802_v46  ;;  %5033 = vmatpush3.bf16.msra.mxu1 %v5823_v48 }
 0x2d5   :  { %5034 = vmatprep.subr.bf16.mxu1 %v5824_v49 }
 0x2d7   :  { %4984 = vmatpush3.bf16.msra.mxu0 %v5803_v50 }
 0x2d8   :  { %4985 = vmatprep.subr.bf16.mxu0 %v5804_v56  ;;  %5035 = vmatpush3.bf16.msra.mxu1 %v5825_v51 }
 0x2d9   :  { %5036 = vmatprep.subr.bf16.mxu1 %v5826_v52 }
 0x2db   :  { %4986 = vmatpush3.bf16.msra.mxu0 %v5805_v53 }
 0x2dc   :  { %4987 = vmatprep.subr.bf16.mxu0 %v5806_v0  ;;  %5037 = vmatpush3.bf16.msra.mxu1 %v5827_v37  ;;  %v5852_v37 = vld [vmem:[#allocation7 + $0x138] sm:$0xff]  }
 0x2dd   :  { %5038 = vmatprep.subr.bf16.mxu1 %v5828_v54 }
 0x2df   :  { %4988 = vmatpush3.bf16.msra.mxu0 %v5807_v55  ;;  %v5853_v55 = vld [vmem:[#allocation7 + $0x130] sm:$0xff]  }
 0x2e0   :  { %4989 = vmatprep.subr.bf16.mxu0 %v5808_v57  ;;  %5039 = vmatpush3.bf16.msra.mxu1 %v5829_v58  ;;  %v5854_v57 = vld [vmem:[#allocation7 + $0x128] sm:$0xff]   ;;  %v5855_v58 = vld [vmem:[#allocation7 + $0x120] sm:$0xff]  }
 0x2e1   :  { %5040 = vmatprep.subr.bf16.mxu1 %v5830_v59  ;;  %v5856_v59 = vld [vmem:[#allocation7 + $0x118] sm:$0xff]  }
 0x2e3   :  { %4990 = vmatpush3.bf16.msra.mxu0 %v5809_v60  ;;  %v5857_v60 = vld [vmem:[#allocation7 + $0x110] sm:$0xff]  }
 0x2e4   :  { %4991 = vmatprep.subr.bf16.mxu0 %v5810_v61  ;;  %5041 = vmatpush3.bf16.msra.mxu1 %v5831_v62  ;;  %v5858_v61 = vld [vmem:[#allocation7 + $0x108] sm:$0xff]   ;;  %v5859_v62 = vld [vmem:[#allocation7 + $0x100] sm:$0xff]  }
 0x2e5   :  { %5042 = vmatprep.subr.bf16.mxu1 %v5832_v63 }
 0x2e7   :  { %4992 = vmatpush3.bf16.msra.mxu0 %v5811_v4 }
 0x2e8   :  { %5132 = vmatprep.subr.bf16.mxu0 %v5971_v36  ;;  %5043 = vmatpush3.bf16.msra.mxu1 %v5833_v1 }
 0x2e9   :  { %5044 = vmatprep.subr.bf16.mxu1 %v5834_v5 }
 0x2ea   :  { %3735 = vmatmul.mubr.bf16.vlgmr.msra.gmra.mxu0 %v6084_v47  ;;  %v5816_v47 = vld [vmem:[#allocation6 + $0x588] ss:$20 sps:$4 sm:$0xff]  }
 0x2eb   :  { %5133 = vmatpush3.bf16.msra.mxu0 %v5812_v3  ;;  %5148 = vmatprep.mubr.msk.bf16.mxu0 %vm5972_vm0, %v5971_v36 }
 0x2ec   :  { %5134 = vmatprep.subr.bf16.mxu0 %v5971_v36  ;;  %5045 = vmatpush3.bf16.msra.mxu1 %v5835_v6 }
 0x2ed   :  { %5152 = vmatprep.subr.bf16.mxu1 %v5971_v36 }
 0x2ef   :  { %5135 = vmatpush3.bf16.msra.mxu0 %v5813_v8 }
 0x2f0   :  { %5136 = vmatprep.subr.bf16.mxu0 %v5971_v36 }
 0x2f3   :  { %5137 = vmatpush3.bf16.msra.mxu0 %v5814_v9 }
 0x2f4   :  { %5138 = vmatprep.subr.bf16.mxu0 %v5971_v36 }
 0x2f7   :  { %5139 = vmatpush3.bf16.msra.mxu0 %v5815_v10 }
 0x2f8   :  { %5140 = vmatprep.subr.bf16.mxu0 %v5971_v36 }
 0x2fb   :  { %5141 = vmatpush3.bf16.msra.mxu0 %v5816_v47 }
 0x2fc   :  { %5142 = vmatprep.subr.bf16.mxu0 %v5971_v36 }
 0x2ff   :  { %5143 = vmatpush3.bf16.msra.mxu0 %v5817_v11 }
 0x300   :  { %5144 = vmatprep.subr.bf16.mxu0 %v5971_v36 }
 0x303   :  { %5145 = vmatpush3.bf16.msra.mxu0 %v5818_v12 }
 0x304   :  { %5146 = vmatprep.subr.bf16.mxu0 %v5971_v36 }
 0x307   :  { %5147 = vmatpush3.bf16.msra.mxu0 %v5819_v13 }
 0x308   :  { %5052 = vmatprep.subr.bf16.mxu0 %v5836_v14 }
 0x30a   :  { %5149 = vmatmul.mubr.bf16.vlgmr.msra.gmra.mxu0 %v6096_v29  ;;  %v5848_v29 = vld [vmem:[#allocation7 + $0xc8] sm:$0xff]  }
 0x30b   :  { %5053 = vmatpush3.bf16.msra.mxu0 %v5837_v15 }
 0x30c   :  { %5054 = vmatprep.subr.bf16.mxu0 %v5838_v16 }
 0x30f   :  { %5055 = vmatpush3.bf16.msra.mxu0 %v5839_v17  ;;  %v3521_v2 = vpop.f32.mrf.mxu1 }
 0x310   :  { %5056 = vmatprep.subr.bf16.mxu0 %v5840_v18  ;;  %v3522_v42 = vadd.f32 %v3521_v2, %v3478_v7 }
 0x311   :  { %v3523_v31 = vpop.f32.mrf.mxu1 }
 0x312   :  { %v3524_v40 = vadd.f32 %v3523_v31, %v3480_v28 }
 0x313   :  { %5057 = vmatpush3.bf16.msra.mxu0 %v5841_v19  ;;  %v3525_v33 = vpop.f32.mrf.mxu1 }
 0x314   :  { %5058 = vmatprep.subr.bf16.mxu0 %v5842_v20  ;;  %v3526_v41 = vadd.f32 %v3525_v33, %v3482_v30 }
 0x315   :  { %v3527_v38 = vpop.f32.mrf.mxu1 }
 0x316   :  { %v3528_v44 = vadd.f32 %v3527_v38, %v3484_v32 }
 0x317   :  { %5059 = vmatpush3.bf16.msra.mxu0 %v5843_v21 }
 0x318   :  { %5060 = vmatprep.subr.bf16.mxu0 %v5844_v22 }
 0x31b   :  { %5061 = vmatpush3.bf16.msra.mxu0 %v5845_v34 }
 0x31c   :  { %5062 = vmatprep.subr.bf16.mxu0 %v5846_v23 }
 0x31f   :  { %5063 = vmatpush3.bf16.msra.mxu0 %v5847_v24 }
 0x320   :  { %5064 = vmatprep.subr.bf16.mxu0 %v5848_v29 }
 0x323   :  { %5065 = vmatpush3.bf16.msra.mxu0 %v5849_v25 }
 0x324   :  { %5066 = vmatprep.subr.bf16.mxu0 %v5850_v26 }
 0x327   :  { %5067 = vmatpush3.bf16.msra.mxu0 %v5851_v27 }
 0x328   :  { %5172 = vmatprep.subr.bf16.mxu0 %v5971_v36 }
 0x34a   :  { %v3564_v35 = vpop.f32.mrf.mxu0 }
 0x34b   :  { %v3565_v48 = vadd.f32 %v3564_v35, %v3522_v42 }
 0x34c   :  { %v3566_v39 = vpop.f32.mrf.mxu0 }
 0x34d   :  { %v3567_v45 = vadd.f32 %v3566_v39, %v3524_v40  ;;  %v3825_v53 = vmax.f32 %v3565_v48, 0.0 }
 0x34e   :  { %v3568_v43 = vpop.f32.mrf.mxu0 }
 0x34f   :  { %v3569_v46 = vadd.f32 %v3568_v43, %v3526_v41  ;;  %v3826_v51 = vmax.f32 %v3567_v45, 0.0  ;;  %v3607_v63 = vpop.f32.mrf.mxu1 }
 0x350   :  { %v3570_v49 = vpop.f32.mrf.mxu0 }
 0x351   :  { %v3571_v50 = vadd.f32 %v3570_v49, %v3528_v44  ;;  %v3830_v56 = vmax.f32 %v3569_v46, 0.0  ;;  %v3609_v4 = vpop.f32.mrf.mxu1 }
 0x353   :  { %v3831_v52 = vmax.f32 %v3571_v50, 0.0  ;;  %v3835_v54 = vpack.c.bf16 %v3830_v56, %v3825_v53  ;;  %v3611_v1 = vpop.f32.mrf.mxu1  ;;  %v5860_v56 = vld [vmem:[%s6177_s5 + $0x38] sm:$0xff]   ;;  %v5863_v53 = vld [vmem:[%s6177_s5 + $0x20] sm:$0xff]  }
 0x355   :  { %v3836_v0 = vpack.c.bf16 %v3831_v52, %v3826_v51  ;;  %v3613_v5 = vpop.f32.mrf.mxu1  ;;  %v5861_v51 = vld [vmem:[%s6177_s5 + $0x30] sm:$0xff]   ;;  %v5862_v52 = vld [vmem:[%s6177_s5 + $0x28] sm:$0xff]  }
 0x357   :  { %4192 = vmatprep.mubr.bf16.mxu1 %v3836_v0  ;;  %v5864_v0 = vld [vmem:[%s6177_s5 + $0x18] sm:$0xff]  }
 0x358   :  { %4193 = vmatmul.mubr.bf16.vlgmr.msra.gmra.mxu1 %v3835_v54  ;;  %v5866_v54 = vld [vmem:[%s6177_s5 + $0x8] sm:$0xff]  }
 0x359   :  { %5153 = vmatpush3.bf16.msra.mxu1 %v5852_v37  ;;  %5168 = vmatprep.mubr.msk.bf16.mxu1 %vm5972_vm0, %v5971_v36  ;;  %v5865_v37 = vld [vmem:[%s6177_s5 + $0x10] sm:$0xff]  }
 0x35a   :  { %5154 = vmatprep.subr.bf16.mxu1 %v5971_v36 }
 0x35d   :  { %5155 = vmatpush3.bf16.msra.mxu1 %v5853_v55  ;;  %v5867_v55 = vld [vmem:[%s6177_s5] sm:$0xff]  }
 0x35e   :  { %5156 = vmatprep.subr.bf16.mxu1 %v5971_v36 }
 0x361   :  { %5157 = vmatpush3.bf16.msra.mxu1 %v5854_v57 }
 0x362   :  { %5158 = vmatprep.subr.bf16.mxu1 %v5971_v36 }
 0x365   :  { %5159 = vmatpush3.bf16.msra.mxu1 %v5855_v58 }
 0x366   :  { %5160 = vmatprep.subr.bf16.mxu1 %v5971_v36 }
 0x369   :  { %5161 = vmatpush3.bf16.msra.mxu1 %v5856_v59 }
 0x36a   :  { %5162 = vmatprep.subr.bf16.mxu1 %v5971_v36 }
 0x36d   :  { %5163 = vmatpush3.bf16.msra.mxu1 %v5857_v60 }
 0x36e   :  { %5164 = vmatprep.subr.bf16.mxu1 %v5971_v36 }
 0x36f   :  { %v3693_v3 = vpop.f32.mrf.mxu1 }
 0x371   :  { %5165 = vmatpush3.bf16.msra.mxu1 %v5858_v61  ;;  %v3695_v6 = vpop.f32.mrf.mxu1 }
 0x372   :  { %5166 = vmatprep.subr.bf16.mxu1 %v5971_v36 }
 0x373   :  { %v3697_v47 = vpop.f32.mrf.mxu1 }
 0x375   :  { %5167 = vmatpush3.bf16.msra.mxu1 %v5859_v62  ;;  %v3699_v18 = vpop.f32.mrf.mxu1 }
 0x38a   :  { %v3650_v8 = vpop.f32.mrf.mxu0 }
 0x38b   :  { %v3651_v11 = vadd.f32 %v3650_v8, %v3607_v63 }
 0x38c   :  { %v3652_v9 = vpop.f32.mrf.mxu0 }
 0x38d   :  { %v3653_v10 = vadd.f32 %v3652_v9, %v3609_v4  ;;  %v3694_v19 = vadd.f32 %v3693_v3, %v3651_v11 }
 0x38e   :  { %v3654_v12 = vpop.f32.mrf.mxu0 }
 0x38f   :  { %v3655_v13 = vadd.f32 %v3654_v12, %v3611_v1  ;;  %v3696_v15 = vadd.f32 %v3695_v6, %v3653_v10  ;;  %v3827_v23 = vmax.f32 %v3694_v19, 0.0  ;;  %v5015_v26 = vpop.f32.mrf.mxu1 }
 0x390   :  { %v3656_v14 = vpop.f32.mrf.mxu0 }
 0x391   :  { %v3698_v16 = vadd.f32 %v3697_v47, %v3655_v13  ;;  %v3657_v17 = vadd.f32 %v3656_v14, %v3613_v5  ;;  %v3828_v22 = vmax.f32 %v3696_v15, 0.0  ;;  %v5016_v7 = vpop.f32.mrf.mxu1 }
 0x392   :  { %v5017_v33 = vadd.f32 %v5016_v7, %v5015_v26 }
 0x393   :  { %v3700_v20 = vadd.f32 %v3699_v18, %v3657_v17  ;;  %v3832_v21 = vmax.f32 %v3698_v16, 0.0  ;;  %v5018_v2 = vpop.f32.mrf.mxu1  ;;  %v4906_v17 = vld [vmem:[%s6178_s6] ss:$0 sm:$0xff] }
 0x395   :  { %v3833_v34 = vmax.f32 %v3700_v20, 0.0  ;;  %v3837_v29 = vpack.c.bf16 %v3832_v21, %v3827_v23  ;;  %v5019_v32 = vpop.f32.mrf.mxu1 }
 0x396   :  { %v5020_v39 = vadd.f32 %v5019_v32, %v5018_v2 }
 0x397   :  { %v3838_v24 = vpack.c.bf16 %v3833_v34, %v3828_v22 }
 0x399   :  { %4233 = vmatprep.mubr.bf16.mxu0 %v3838_v24 }
 0x39a   :  { %4234 = vmatmul.mubr.bf16.vlgmr.msra.gmra.mxu0 %v3837_v29 }
 0x39b   :  { %5188 = vmatprep.mubr.msk.bf16.mxu0 %vm5972_vm0, %v5971_v36  ;;  %5173 = vmatpush3.bf16.msra.mxu0 %v5860_v56 }
 0x39c   :  { %5174 = vmatprep.subr.bf16.mxu0 %v5971_v36 }
 0x39f   :  { %5175 = vmatpush3.bf16.msra.mxu0 %v5861_v51 }
 0x3a0   :  { %5176 = vmatprep.subr.bf16.mxu0 %v5971_v36 }
 0x3a3   :  { %5177 = vmatpush3.bf16.msra.mxu0 %v5862_v52 }
 0x3a4   :  { %5178 = vmatprep.subr.bf16.mxu0 %v5971_v36 }
 0x3a7   :  { %5179 = vmatpush3.bf16.msra.mxu0 %v5863_v53 }
 0x3a8   :  { %5180 = vmatprep.subr.bf16.mxu0 %v5971_v36 }
 0x3aa   :  { %v4993_v25 = vpop.f32.mrf.mxu0 }
 0x3ab   :  { %5181 = vmatpush3.bf16.msra.mxu0 %v5864_v0 }
 0x3ac   :  { %v4994_v27 = vpop.f32.mrf.mxu0  ;;  %5182 = vmatprep.subr.bf16.mxu0 %v5971_v36 }
 0x3ad   :  { %v4995_v31 = vadd.f32 %v4994_v27, %v4993_v25 }
 0x3ae   :  { %v4996_v28 = vpop.f32.mrf.mxu0 }
 0x3af   :  { %v3778_v40 = vadd.f32 %v5017_v33, %v4995_v31  ;;  %5183 = vmatpush3.bf16.msra.mxu0 %v5865_v37 }
 0x3b0   :  { %v4997_v30 = vpop.f32.mrf.mxu0  ;;  %5184 = vmatprep.subr.bf16.mxu0 %v5971_v36 }
 0x3b1   :  { %v4998_v35 = vadd.f32 %v4997_v30, %v4996_v28 }
 0x3b3   :  { %v3781_v43 = vadd.f32 %v5020_v39, %v4998_v35  ;;  %5185 = vmatpush3.bf16.msra.mxu0 %v5866_v54 }
 0x3b4   :  { %5186 = vmatprep.subr.bf16.mxu0 %v5971_v36 }
 0x3b7   :  { %5187 = vmatpush3.bf16.msra.mxu0 %v5867_v55 }
 0x3ca   :  { %v3818_v38 = vpop.f32.mrf.mxu0 }
 0x3cb   :  { %v3819_v42 = vadd.f32 %v3818_v38, %v3778_v40 }
 0x3cc   :  { %v5150_v41 = vpop.f32.mrf.mxu0 }
 0x3cd   :  { %v3829_v48 = vmax.f32 %v3819_v42, 0.0 }
 0x3ce   :  { %v3821_v44 = vpop.f32.mrf.mxu0 }
 0x3cf   :  { %v3822_v45 = vadd.f32 %v3821_v44, %v3781_v43 }
 0x3d0   :  { %v5151_v46 = vpop.f32.mrf.mxu0 }
 0x3d1   :  { %v3834_v49 = vmax.f32 %v3822_v45, 0.0 }
 0x3d3   :  { %v3839_v50 = vpack.c.bf16 %v3834_v49, %v3829_v48 }
 0x3d5   :  { %5169 = vmatmul.mubr.bf16.vlgmr.msra.gmra.mxu1 %v3839_v50 }
 0x418   :  { %v5046_v58 = vpop.f32.mrf.mxu1 }
 0x41a   :  { %v5047_v60 = vpop.f32.mrf.mxu1 }
 0x41b   :  { %v5048_v5 = vadd.f32 %v5047_v60, %v5046_v58 }
 0x41c   :  { %v5049_v62 = vpop.f32.mrf.mxu1 }
 0x41e   :  { %v5050_v1 = vpop.f32.mrf.mxu1 }
 0x41f   :  { %v5051_v8 = vadd.f32 %v5050_v1, %v5049_v62 }
 0x45a   :  { %v5068_v57 = vpop.f32.mrf.mxu0 }
 0x45c   :  { %v5069_v59 = vpop.f32.mrf.mxu0 }
 0x45d   :  { %v5070_v4 = vadd.f32 %v5069_v59, %v5068_v57 }
 0x45e   :  { %v5071_v61 = vpop.f32.mrf.mxu0 }
 0x45f   :  { %v4236_v9 = vadd.f32 %v5070_v4, %v5048_v5 }
 0x460   :  { %v5072_v63 = vpop.f32.mrf.mxu0 }
 0x461   :  { %v5073_v3 = vadd.f32 %v5072_v63, %v5071_v61 }
 0x463   :  { %v4239_v47 = vadd.f32 %v5073_v3, %v5051_v8 }
 0x495   :  { %v4276_v6 = vpop.f32.mrf.mxu1 }
 0x496   :  { %v4277_v10 = vadd.f32 %v4276_v6, %v4236_v9 }
 0x497   :  { %v5170_v36 = vpop.f32.mrf.mxu1 }
 0x498   :  { %v4283_v14 = vmax.f32 %v4277_v10, 0.0 }
 0x499   :  { %v4279_v11 = vpop.f32.mrf.mxu1 }
 0x49a   :  { %v4280_v12 = vadd.f32 %v4279_v11, %v4239_v47 }
 0x49b   :  { %v5171_v13 = vpop.f32.mrf.mxu1 }
 0x49c   :  { %v4284_v15 = vmax.f32 %v4280_v12, 0.0 }
 0x49e   :  { %v4285_v16 = vpack.c.bf16 %v4284_v15, %v4283_v14 }
 0x4a0   :  { %5189 = vmatmul.mubr.bf16.vlgmr.msra.gmra.mxu0 %v4285_v16 }
 0x560   :  { %v4391_v18 = vpop.f32.mrf.mxu0 }
 0x561   :  { %v4392_v19 = vadd.f32 %v4906_v17, %v4391_v18 }
 0x562   :  { %v5190_v20 = vpop.f32.mrf.mxu0 }
 0x563   :  { %4398 = vmax.xlane.f32.xlu0 %v4392_v19 }
 0x564   :  { %v4394_v21 = vpop.f32.mrf.mxu0 }
 0x565   :  { %v4395_v22 = vadd.f32 %v4906_v17, %v4394_v21 }
 0x566   :  { %v5191_v34 = vpop.f32.mrf.mxu0 }
 0x567   :  { %4400 = vmax.xlane.f32.xlu0 %v4395_v22 }
 0x5ec   :  { %v4399_v23 = vpop.xlane.xlu0 %4398 }
 0x5ed   :  { %v4402_v24 = vsub.f32 %v4392_v19, %v4399_v23 }
 0x5ef   :  { %v4404_v29 = vmul.f32 1.442695, %v4402_v24 }
 0x5f0   :  { %v4401_v25 = vpop.xlane.xlu0 %4400 }
 0x5f1   :  { %5868 = vpow2.f32 %v4404_v29  ;;  %v4403_v26 = vsub.f32 %v4395_v22, %v4401_v25 }
 0x5f3   :  { %v4406_v27 = vmul.f32 1.442695, %v4403_v26 }
 0x5f5   :  { %5870 = vpow2.f32 %v4406_v27 }
 0x5fe   :  { %v5869_v7 = vpop.eup %5868 }
 0x5ff   :  { %4408 = vadd.xlane.f32.xlu1 %v5869_v7 }
 0x602   :  { %v5871_v28 = vpop.eup %5870 }
 0x603   :  { %4410 = vadd.xlane.f32.xlu1 %v5871_v28 }
 0x688   :  { %v4409_v2 = vpop.xlane.xlu1 %4408 }
 0x689   :  { %5872 = vrcp.f32 %v4409_v2 }
 0x68c   :  { %v4411_v30 = vpop.xlane.xlu1 %4410 }
 0x68d   :  { %5874 = vrcp.f32 %v4411_v30 }
 0x696   :  { %v5873_v31 = vpop.eup %5872 }
 0x697   :  { %v4414_v32 = vmul.f32 %v5873_v31, %v5869_v7 }
 0x699   :  { %4416 = vst [vmem:[%s6179_s7] sm:$0xff] %v4414_v32 }
 0x69a   :  { %v5875_v33 = vpop.eup %5874 }
 0x69b   :  { %v4415_v35 = vmul.f32 %v5875_v33, %v5871_v28 }
 0x69d   :  { %4417 = vst [vmem:[%s6179_s7 + $0x8] sm:$0xff] %v4415_v35 }
 0x69e   :  { %4422 = vsyncpa [#allocation3], 1 }
 0x69f   :  { %4423 = vsyncpa [#allocation5], 1 }
 0x6a0   :  { %4424 = vsyncpa [#allocation8], 1 }

</bundles_post_ra>
